<compile_context>
chip_gen: v7x
topology: tpu7x:2x2x1
jax: 0.10.0
libtpu: 0.0.40
codegen_flags: <defaults>
</compile_context>

<pallas_src>
import functools

import jax
import jax.numpy as jnp
from jax import lax
from jax.experimental import pallas as pl
from jax.experimental.pallas import tpu as pltpu


def _si_sdr_kernel(out_ref, tgt_ref, loss_ref, *, eps: float):
    output = out_ref[...].astype(jnp.float32)         # (B, T) f32
    target = tgt_ref[...].astype(jnp.float32)         # (B, T) f32
    B, T = output.shape

    ones_row = jnp.ones((1, T), dtype=jnp.float32)

    def row_sum(x):
        # (B, T) -> lane-dense (1, B): contract the T axis on the MXU, exact f32.
        return lax.dot_general(
            ones_row, x,
            dimension_numbers=(((1,), (1,)), ((), ())),
            preferred_element_type=jnp.float32,
            precision=lax.Precision.HIGHEST)

    ot = output * target                               # (B, T)
    tt = target * target                               # (B, T)

    s = row_sum(ot)                                    # (1, B): s[i] = <o_i, t_i>
    tnorm_sq = row_sum(tt)                             # (1, B): ||t_j||^2, lane j
    d_row = row_sum(output * output)                   # (1, B): D[i] = ||o_i||^2

    # alpha[i, j] = s[i] * inv[j]  (torch's (B,1)/(B,) broadcast; inherited
    # behavior: no eps in this denominator, so a zero-energy target row gives
    # inf/nan exactly like the reference).
    inv = pl.reciprocal(tnorm_sq, approx=False)        # (1, B) == (1, T)

    a_row = row_sum(tt * (inv * inv))                  # (1, B): sum_j inv_j^2 t_ij^2
    c_row = row_sum(ot * inv)                          # (1, B): sum_j inv_j t_ij o_ij

    proj_sq = s * s * a_row                            # (1, B)
    diff_sq = proj_sq - 2.0 * s * c_row + d_row        # (1, B)

    si_sdr = 10.0 * jnp.log10(proj_sq / (diff_sq + eps))   # (1, B), one EUP vreg

    # loss = -mean(si_sdr): single-vreg lane reduce into the (1, 1) output tile.
    loss_ref[...] = -jnp.sum(si_sdr, axis=1, keepdims=True) / float(B)


def si_sdr_loss_batched(output: jax.Array, target: jax.Array,
                        eps: float = 1e-9) -> jax.Array:
    """N independent (B, T) SI-SDR loss problems in one pallas_call -> (N,) losses."""
    assert output.shape == target.shape and output.ndim == 3
    N, B, T = output.shape
    # The reference module's broadcasting (missing keepdim) requires B == T.
    assert B == T, "reference torch module only broadcasts correctly when B == T"

    kernel = functools.partial(_si_sdr_kernel, eps=eps)
    losses = pl.pallas_call(
        kernel,
        out_shape=jax.ShapeDtypeStruct((N, 1, 1), jnp.float32),
        grid=(N,),
        in_specs=[
            pl.BlockSpec((None, B, T), lambda n: (n, 0, 0)),
            pl.BlockSpec((None, B, T), lambda n: (n, 0, 0)),
        ],
        out_specs=pl.BlockSpec((None, 1, 1), lambda n: (n, 0, 0)),
        compiler_params=pltpu.CompilerParams(
            dimension_semantics=("parallel",)),   # megacore split on v7x
    )(output, target)
    return losses[:, 0, 0]


def si_sdr_loss(output: jax.Array, target: jax.Array, eps: float = 1e-9) -> jax.Array:
    """Single-problem entry point matching the module: (B, T) inputs -> scalar loss."""
    assert output.shape == target.shape and output.ndim == 2
    return si_sdr_loss_batched(output[None], target[None], eps=eps)[0]


def _si_sdr_loss_ref(output, target, eps=1e-9):
    # Pure-JAX transliteration of the PyTorch forward (same buggy broadcasting).
    output = output.astype(jnp.float32)
    target = target.astype(jnp.float32)
    s = jnp.sum(output * target, axis=-1, keepdims=True)       # (B, 1)
    n = jnp.linalg.norm(target, axis=-1)                        # (B,)
    alpha = s / (n ** 2)                                        # (B, B)
    proj = alpha * target                                       # (B, B), B == T
    proj_norm = jnp.linalg.norm(proj, axis=-1)
    diff_norm = jnp.linalg.norm(proj - output, axis=-1)
    return -(10.0 * jnp.log10(proj_norm ** 2 / (diff_norm ** 2 + eps))).mean()


if __name__ == "__main__":
    key = jax.random.PRNGKey(0)
    k1, k2 = jax.random.split(key)
    N, B, T = 4, 128, 128   # B == T required by the reference module's broadcast
    output = jax.random.normal(k1, (N, B, T), dtype=jnp.float32)
    target = jax.random.normal(k2, (N, B, T), dtype=jnp.float32)

    # Batched path: one pallas_call, parallel grid over the N problems.
    losses = si_sdr_loss_batched(output, target)
    jax.block_until_ready(losses)

    refs = jnp.stack([_si_sdr_loss_ref(output[n], target[n]) for n in range(N)])
    assert jnp.allclose(losses, refs, rtol=1e-3, atol=1e-4), (losses, refs)

    # Single-problem path (module semantics: forward(output, target) -> scalar).
    loss0 = si_sdr_loss(output[0], target[0])
    jax.block_until_ready(loss0)
    assert jnp.allclose(loss0, refs[0], rtol=1e-3, atol=1e-4), (loss0, refs[0])

    print("KERNEL_OK")
</pallas_src>

<mosaic_0001>
module attributes {stable_mosaic.version = 11 : i64} {
  func.func @_si_sdr_kernel(%arg0: i32, %arg1: memref<1x128x128xf32, #tpu.memory_space<vmem>>, %arg2: memref<1x128x128xf32, #tpu.memory_space<vmem>>, %arg3: memref<1x1x1xf32, #tpu.memory_space<vmem>>) attributes {dimension_semantics = [#tpu.dimension_semantics<parallel>], iteration_bounds = array<i64: 4>, scalar_prefetch = 0 : i64, scratch_operands = 0 : i64, tpu.core_type = #tpu.core_type<tc>, window_params = [{transform_indices = @transform_0, window_bounds = array<i64: 1, 128, 128>}, {transform_indices = @transform_1, window_bounds = array<i64: 1, 128, 128>}, {transform_indices = @transform_2, window_bounds = array<i64: 1, 1, 1>}]} {
    %c0 = arith.constant 0 : index
    %c0_0 = arith.constant 0 : index
    %c0_1 = arith.constant 0 : index
    %0 = vector.load %arg1[%c0, %c0_0, %c0_1] : memref<1x128x128xf32, #tpu.memory_space<vmem>>, vector<1x128x128xf32>
    %1 = vector.shape_cast %0 : vector<1x128x128xf32> to vector<128x128xf32>
    %c0_2 = arith.constant 0 : index
    %c0_3 = arith.constant 0 : index
    %c0_4 = arith.constant 0 : index
    %2 = vector.load %arg2[%c0_2, %c0_3, %c0_4] : memref<1x128x128xf32, #tpu.memory_space<vmem>>, vector<1x128x128xf32>
    %3 = vector.shape_cast %2 : vector<1x128x128xf32> to vector<128x128xf32>
    %cst = arith.constant 1.000000e+00 : f32
    %4 = vector.broadcast %cst : f32 to vector<1x128xf32>
    %5 = arith.mulf %1, %3 : vector<128x128xf32>
    %6 = arith.mulf %3, %3 : vector<128x128xf32>
    %cst_5 = arith.constant dense<0.000000e+00> : vector<1x128xf32>
    %7 = tpu.matmul %4, %5, %cst_5 {dimension_numbers = #tpu.dot_dimension_numbers<[1], [1], [0], [0], [0, 0, 1, 0], [], []>, precision = #tpu.contract_precision<fp32>} : vector<1x128xf32>, vector<128x128xf32>, vector<1x128xf32> -> vector<1x128xf32>
    %cst_6 = arith.constant dense<0.000000e+00> : vector<1x128xf32>
    %8 = tpu.matmul %4, %6, %cst_6 {dimension_numbers = #tpu.dot_dimension_numbers<[1], [1], [0], [0], [0, 0, 1, 0], [], []>, precision = #tpu.contract_precision<fp32>} : vector<1x128xf32>, vector<128x128xf32>, vector<1x128xf32> -> vector<1x128xf32>
    %9 = arith.mulf %1, %1 : vector<128x128xf32>
    %cst_7 = arith.constant dense<0.000000e+00> : vector<1x128xf32>
    %10 = tpu.matmul %4, %9, %cst_7 {dimension_numbers = #tpu.dot_dimension_numbers<[1], [1], [0], [0], [0, 0, 1, 0], [], []>, precision = #tpu.contract_precision<fp32>} : vector<1x128xf32>, vector<128x128xf32>, vector<1x128xf32> -> vector<1x128xf32>
    %11 = tpu.reciprocal %8 : vector<1x128xf32> -> vector<1x128xf32>
    %12 = arith.mulf %11, %11 : vector<1x128xf32>
    %13 = vector.broadcast %12 : vector<1x128xf32> to vector<128x128xf32>
    %14 = arith.mulf %6, %13 : vector<128x128xf32>
    %cst_8 = arith.constant dense<0.000000e+00> : vector<1x128xf32>
    %15 = tpu.matmul %4, %14, %cst_8 {dimension_numbers = #tpu.dot_dimension_numbers<[1], [1], [0], [0], [0, 0, 1, 0], [], []>, precision = #tpu.contract_precision<fp32>} : vector<1x128xf32>, vector<128x128xf32>, vector<1x128xf32> -> vector<1x128xf32>
    %16 = vector.broadcast %11 : vector<1x128xf32> to vector<128x128xf32>
    %17 = arith.mulf %5, %16 : vector<128x128xf32>
    %cst_9 = arith.constant dense<0.000000e+00> : vector<1x128xf32>
    %18 = tpu.matmul %4, %17, %cst_9 {dimension_numbers = #tpu.dot_dimension_numbers<[1], [1], [0], [0], [0, 0, 1, 0], [], []>, precision = #tpu.contract_precision<fp32>} : vector<1x128xf32>, vector<128x128xf32>, vector<1x128xf32> -> vector<1x128xf32>
    %19 = arith.mulf %7, %7 : vector<1x128xf32>
    %20 = arith.mulf %19, %15 : vector<1x128xf32>
    %cst_10 = arith.constant 2.000000e+00 : f32
    %21 = vector.broadcast %cst_10 : f32 to vector<1x128xf32>
    %22 = arith.mulf %21, %7 : vector<1x128xf32>
    %23 = arith.mulf %22, %18 : vector<1x128xf32>
    %24 = arith.subf %20, %23 : vector<1x128xf32>
    %25 = arith.addf %24, %10 : vector<1x128xf32>
    %cst_11 = arith.constant 9.99999971E-10 : f32
    %26 = vector.broadcast %cst_11 : f32 to vector<1x128xf32>
    %27 = arith.addf %25, %26 : vector<1x128xf32>
    %28 = arith.divf %20, %27 : vector<1x128xf32>
    %29 = math.log %28 : vector<1x128xf32>
    %cst_12 = arith.constant 0.434294492 : f32
    %30 = vector.broadcast %cst_12 : f32 to vector<1x128xf32>
    %31 = arith.mulf %29, %30 : vector<1x128xf32>
    %cst_13 = arith.constant 1.000000e+01 : f32
    %32 = vector.broadcast %cst_13 : f32 to vector<1x128xf32>
    %33 = arith.mulf %32, %31 : vector<1x128xf32>
    %cst_14 = arith.constant dense<0.000000e+00> : vector<1xf32>
    %34 = vector.multi_reduction <add>, %33, %cst_14 [1] : vector<1x128xf32> to vector<1xf32>
    %35 = vector.shape_cast %34 : vector<1xf32> to vector<1x1xf32>
    %cst_15 = arith.constant 0.000000e+00 : f32
    %36 = vector.broadcast %cst_15 : f32 to vector<1x1xf32>
    %37 = arith.subf %36, %35 : vector<1x1xf32>
    %cst_16 = arith.constant 1.280000e+02 : f32
    %38 = vector.broadcast %cst_16 : f32 to vector<1x1xf32>
    %39 = arith.divf %37, %38 : vector<1x1xf32>
    %c0_17 = arith.constant 0 : index
    %c0_18 = arith.constant 0 : index
    %c0_19 = arith.constant 0 : index
    %40 = vector.load %arg3[%c0_17, %c0_18, %c0_19] : memref<1x1x1xf32, #tpu.memory_space<vmem>>, vector<1x1x1xf32>
    %41 = vector.shape_cast %40 : vector<1x1x1xf32> to vector<1x1xf32>
    %42 = vector.shape_cast %39 : vector<1x1xf32> to vector<1x1x1xf32>
    tpu.vector_store %arg3[%c0_17, %c0_18, %c0_19], %42 {strides = array<i32>} : memref<1x1x1xf32, #tpu.memory_space<vmem>>, vector<1x1x1xf32>,
    return
  }
  func.func @transform_0(%arg0: i32) -> (i32, i32, i32) {
    %c0_i32 = arith.constant 0 : i32
    %c0_i32_0 = arith.constant 0 : i32
    %c0_i32_1 = arith.constant 0 : i32
    return %arg0, %c0_i32, %c0_i32_0 : i32, i32, i32
  }
  func.func @transform_1(%arg0: i32) -> (i32, i32, i32) {
    %c0_i32 = arith.constant 0 : i32
    %c0_i32_0 = arith.constant 0 : i32
    %c0_i32_1 = arith.constant 0 : i32
    return %arg0, %c0_i32, %c0_i32_0 : i32, i32, i32
  }
  func.func @transform_2(%arg0: i32) -> (i32, i32, i32) {
    %c0_i32 = arith.constant 0 : i32
    %c0_i32_0 = arith.constant 0 : i32
    %c0_i32_1 = arith.constant 0 : i32
    return %arg0, %c0_i32, %c0_i32_0 : i32, i32, i32
  }
}

</mosaic_0001>

<bundles_post_ra>
// kernel: tpu_custom_call.1
= control target key start
LH: loop header
LB: loop body
LE: loop exit
PB: predicated region body
PF: predicated region fallthrough
CT: control target
= control target key end

     0   :  { %7 = vsyncpa [#allocation3], 0  ;;  %s8177_s0 = inlined_call_operand.hbm [shape: f32[4,128,128], index: 0, kind: input, shape index: {}]   ;;  %s8178_s1 = inlined_call_operand.hbm [shape: f32[4,128,128], index: 1, kind: input, shape index: {}]   ;;  %s8179_s2 = inlined_call_operand.vmem [shape: f32[4,1,1], index: 2, kind: output, shape index: {}]  }
   0x1   :  { %9 = vsyncpa [#allocation3 + $0x1], 0 }
   0x2   :  { %10 = vsyncpa [#allocation5], 0 }
   0x3   :  { %12 = vsyncpa [#allocation5 + $0x1], 0  ;;  %s6083_s9 = smov 0   ;;  %s6085_s10 = smov 0  }
   0x4   :  { %s6087_s11 = smov 0   ;;  %s6089_s12 = smov 0  }
   0x5 LB: > { %s6102_s13 = sadd.s32 4294967295, %s6058_s12   ;;  %s6105_s14 = sadd.s32 1, %s6058_s12   ;;  %s6058_s12 = sphi %s6089_s12, %s8590_s12   ;;  %s6054_s11 = sphi %s6087_s11, %s8589_s11   ;;  %s6050_s10 = sphi %s6085_s10, %s8588_s10   ;;  %s6046_s9 = sphi %s6083_s9, %s8587_s9  }
   0x6   : > { %s22_s15 = ssub.s32 %s6058_s12, %s6105_s14  ;;  %s25_s16 = sadd.s32 1, %s6054_s11 }
   0x7   : > { %p23_p0 = scmp.eq.s32.totalorder %s22_s15, 0  ;;  %p32_p1 = scmp.ne.s32.totalorder %s6054_s11, %s6050_s10 }
   0x8   : > { %p33_p2 = scmp.eq.s32.totalorder %s6058_s12, 0  ;;  %p38_p3 = scmp.ne.s32.totalorder %s6050_s10, %s6046_s9 }
   0x9   : > { %s6115_s17 = scalar_select %p23_p0, %s6054_s11, %s25_s16  }
   0xa   : > { %p34_p4 = por %p33_p2, %p32_p1  ;;  %p39_p5 = scmp.eq.s32.totalorder %s6102_s13, 0 }
   0xb   : > { %p5913_p6 = scmp.lt.s32.totalorder %s6058_s12, 4  ;;  %s6124_s19 = sand.u32 1, %s6054_s11  }
   0xc   : > { %p6119_p7 = por %p39_p5, %p38_p3  ;;  %s3569_s20 = sshll.u32 %s6124_s19, 7 }
   0xd   : > { %s3580_s21 = sshll.u32 %s6058_s12, 11  ;;  %s118_s25 = scalar_lea.vmem [#allocation2], %s3569_s20 }
   0xe   : > { %s8291_s18 = scalar_select %p6119_p7, 1, 0 }
   0xf   : > { %s6133_s24 = scalar_lea.hbm %s8177_s0, %s3580_s21  ;;  %s125_s26 = sshll.u32 %s118_s25, 4  ;;  %s6137_s26 = int_to_ptr.vmem [resolvable:$true] %s125_s26 }
  0x10   : > { %p6139_p8 = pnand %p5913_p6, %p34_p4  ;;  %s115_s28 = scalar_lea.sflag [#allocation3], %s6124_s19 }
  0x11   : > { %s5960_s29 = scalar_lea.hbm %s6133_s24, 2048  ;;  %s5965_s4 = scalar_lea.hbm %s8177_s0, 8192 }
  0x12   : > { %p5961_p10 = scmp.ne.s32.totalorder %s6133_s24, %s5960_s29  ;;  %p5962_p11 = pneg %p6139_p8 }
  0x13   : > { %p5966_p0 = scmp.lt.u32.totalorder %s6133_s24, %s8177_s0  ;;  %p5967_p1 = scmp.lt.u32.totalorder %s5965_s4, %s5960_s29 }
  0x14   : > { %p5963_p12 = pnand %p5962_p11, %p5961_p10  ;;  %p5969_p3 = scmp.lt.u32.totalorder %s5960_s29, %s6133_s24 }
  0x15   : > { %p5968_p2 = por %p5967_p1, %p5966_p0 }
  0x16   : > { %p5964_p13 = pneg %p5963_p12 }
  0x17   : > { %p5970_p4 = por %p5969_p3, %p5968_p2 }
  0x19   : > { %p5971_p5 = pnand %p5970_p4, %p5964_p13 }
  0x1b   : > { %5974 = shalt.err (!%p5971_p5)
}
  0x1c   : > { %s5975_s7 = scalar_lea.vmem %s6137_s26, 2048  ;;  %s6060_s8 = smov [#allocation2]  }
  0x1d   : > { %p5976_p6 = scmp.ne.s32.totalorder %s6137_s26, %s5975_s7  ;;  %s5980_s9 = sshll.u32 %s6060_s8, 4  ;;  %s5981_s9 = int_to_ptr.vmem [resolvable:$false] %s5980_s9 }
  0x1e   : > { %s5982_s15 = scalar_lea.vmem %s5981_s9, 4096  ;;  %p5983_p9 = scmp.lt.s32.totalorder %s6137_s26, %s5981_s9 }
  0x1f   : > { %p5978_p10 = pnand %p5976_p6, %p5962_p11  ;;  %p5984_p0 = scmp.lt.s32.totalorder %s5982_s15, %s5975_s7 }
  0x21   : > { %p5979_p12 = pneg %p5978_p10  ;;  %p5985_p1 = por %p5984_p0, %p5983_p9 }
  0x23   : > { %p5986_p2 = pnand %p5985_p1, %p5979_p12 }
  0x25   : > { %5989 = shalt.err (!%p5986_p2)
}
  0x26   : > { %s6061_s16 = smov 128   ;;  %s6062_s22 = smov 8  }
  0x27   : > { %5909 = dma.hbm_to_vmem [thread:$0]  (!%p6139_p8), %s6133_s24, 2048, %s6137_s26, %s115_s28, %s6061_s16, %s6061_s16, %s6062_s22  }
  0x28   : > { %p154_p9 = scmp.lt.s32.totalorder %s6058_s12, 5  ;;  %s6181_s29 = scalar_lea.hbm %s8178_s1, %s3580_s21 }
  0x29   : > { %p8293_p13 = scmp.ge.s32.totalorder %s6058_s12, 1  ;;  %s139_s3 = scalar_lea.vmem [#allocation4], %s3569_s20 }
  0x2a   : > { %s146_s4 = sshll.u32 %s139_s3, 4  ;;  %s136_s24 = scalar_lea.sflag [#allocation5], %s6124_s19  ;;  %s6191_s4 = int_to_ptr.vmem [resolvable:$true] %s146_s4 }
  0x2b   : > { %p6185_p3 = pnand %p8293_p13, %p154_p9  ;;  %s5990_s26 = scalar_lea.hbm %s6181_s29, 2048 }
  0x2c   : > { %p5991_p4 = scmp.ne.s32.totalorder %s6181_s29, %s5990_s26  ;;  %s5995_s28 = scalar_lea.hbm %s8178_s1, 8192 }
  0x2d   : > { %p5996_p10 = scmp.lt.u32.totalorder %s6181_s29, %s8178_s1  ;;  %p5997_p12 = scmp.lt.u32.totalorder %s5995_s28, %s5990_s26 }
  0x2e   : > { %p5993_p5 = pnand %p5991_p4, %p5962_p11  ;;  %p5999_p1 = scmp.lt.u32.totalorder %s5990_s26, %s6181_s29 }
  0x2f   : > { %p5998_p0 = por %p5997_p12, %p5996_p10 }
  0x30   : > { %p5994_p6 = pneg %p5993_p5 }
  0x31   : > { %p6000_p2 = por %p5999_p1, %p5998_p0 }
  0x33   : > { %p6001_p9 = pnand %p6000_p2, %p5994_p6 }
  0x35   : > { %6004 = shalt.err (!%p6001_p9)
}
  0x36   : > { %s6005_s20 = scalar_lea.vmem %s6191_s4, 2048  ;;  %s6063_s7 = smov [#allocation4]  }
  0x37   : > { %p6006_p13 = scmp.ne.s32.totalorder %s6191_s4, %s6005_s20  ;;  %s6010_s8 = sshll.u32 %s6063_s7, 4  ;;  %s6011_s8 = int_to_ptr.vmem [resolvable:$false] %s6010_s8 }
  0x38   : > { %s6012_s9 = scalar_lea.vmem %s6011_s8, 4096  ;;  %p6013_p7 = scmp.lt.s32.totalorder %s6191_s4, %s6011_s8 }
  0x39   : > { %p6008_p4 = pnand %p6006_p13, %p5962_p11  ;;  %p6014_p10 = scmp.lt.s32.totalorder %s6012_s9, %s6005_s20 }
  0x3b   : > { %p6009_p5 = pneg %p6008_p4  ;;  %p6015_p12 = por %p6014_p10, %p6013_p7 }
  0x3d   : > { %p6016_p0 = pnand %p6015_p12, %p6009_p5 }
  0x3f   : > { %6019 = shalt.err (!%p6016_p0)
}
  0x40   : > { %5912 = dma.hbm_to_vmem [thread:$0]  (!%p6139_p8), %s6181_s29, 2048, %s6191_s4, %s136_s24, %s6061_s16, %s6061_s16, %s6062_s22  }
  0x41   : > { %158 = sbr.rel (%p6185_p3) target bundleno = 1484 (0x5cc), region = 28 }
  0x48   : > { %s160_s15 = sand.u32 1, %s6050_s10   ;;  %p8295_p7 = scmp.ne.s32.totalorder %s8291_s18, 0 }
  0x49   : > { %s3576_s23 = sshll.u32 %s160_s15, 7  ;;  %s161_s25 = scalar_lea.sflag [#allocation3], %s160_s15 }
  0x4a   : > { %s6225_s3 = scalar_lea.vmem [#allocation2], %s3576_s23 }
  0x4b   : > { %6037 = dma.done.wait (%p8295_p7), %s161_s25, 2048  }
  0x4c   : > { %6039 = vsyncadd (%p8295_p7), %s161_s25, 4294965248  ;;  %s170_s19 = scalar_lea.sflag [#allocation5], %s160_s15  ;;  %s6231_s27 = scalar_lea.vmem [#allocation4], %s3576_s23 }
  0x4d   : > { %6041 = dma.done.wait (%p8295_p7), %s170_s19, 2048  }
  0x4e   : > { %6043 = vsyncadd (%p8295_p7), %s170_s19, 4294965248  ;;  %v8196_v0 = vmov 0.0|0.0   ;;  %vm6065_vm0 = vmmov 0   ;;  %v8181_v1 = vmov 0.0   ;;  %v200_v2 = vld [vmem:[%s6225_s3] sm:$0xff]  ;;  %v201_v3 = vld [vmem:[%s6225_s3 + $0x8] sm:$0xff] }
  0x4f   : > { %5142 = vmatprep.subr.bf16.mxu0 %v8196_v0  ;;  %5286 = vmatprep.subr.bf16.mxu1 %v8196_v0  ;;  %v216_v4 = vld [vmem:[%s6231_s27] sm:$0xff]  ;;  %v217_v5 = vld [vmem:[%s6231_s27 + $0x8] sm:$0xff]  ;;  %v6252_v8 = vld [vmem:[%s6225_s3 + $0x10] sm:$0xff]  ;;  %vm3475_vm1 = vcmask 1040384   ;;  %p197_p8 = scmp.lt.s32.totalorder %s6102_s13, 3  ;;  %vm3482_vm2 = vcmask 0  }
  0x50   : > { %4124 = vmatprep.mubr.msk.f32.mxu0 %vm6065_vm0, %v8181_v1  ;;  %4334 = vmatprep.mubr.msk.f32.mxu1 %vm6065_vm0, %v8181_v1  ;;  %v6247_v6 = vmul.f32 %v216_v4, %v200_v2  ;;  %v6249_v7 = vmul.f32 %v216_v4, %v216_v4  ;;  %8298 = vst [vmem:[#allocation10_spill] sm:$0xff] %v6252_v8  ;;  %v6255_v9 = vld [vmem:[%s6225_s3 + $0x18] sm:$0xff]  ;;  %v218_v12 = vld [vmem:[%s6231_s27 + $0x10] sm:$0xff]  ;;  %v6296_v28 = vld [vmem:[%s6225_s3 + $0x20] sm:$0xff] }
  0x51   : > { %8299 = vst [vmem:[#allocation11_spill] sm:$0xff] %v6255_v9  ;;  %v6257_v10 = vmul.f32 %v217_v5, %v201_v3  ;;  %v6259_v11 = vmul.f32 %v217_v5, %v217_v5  ;;  %v219_v13 = vld [vmem:[%s6231_s27 + $0x18] sm:$0xff]  ;;  %v6266_v16 = vmul.f32 %v218_v12, %v6252_v8  ;;  %v6273_v20 = vmul.f32 %v218_v12, %v218_v12  ;;  %v220_v29 = vld [vmem:[%s6231_s27 + $0x20] sm:$0xff]  ;;  %v6302_v30 = vld [vmem:[%s6225_s3 + $0x28] sm:$0xff]  ;;  %s8592_s13 = smov (!%p197_p8, %s6102_s13), 3 }
  0x52   : > { %8296 = vst [vmem:[#allocation8_spill] sm:$0xff] %v6247_v6  ;;  %8297 = vst [vmem:[#allocation9_spill] sm:$0xff] %v6249_v7  ;;  %v265_v14 = vand.u32 4294901760, %v6247_v6  ;;  %v893_v15 = vand.u32 4294901760, %v6249_v7  ;;  %v6269_v17 = vmul.f32 %v219_v13, %v6255_v9  ;;  %v6275_v21 = vmul.f32 %v219_v13, %v219_v13  ;;  %v221_v31 = vld [vmem:[%s6231_s27 + $0x28] sm:$0xff]  ;;  %v6328_v38 = vld [vmem:[%s6225_s3 + $0x30] sm:$0xff]  ;;  %s199_s22 = scalar_lea.vmem %s8179_s2, %s8592_s13 }
  0x53   : > { %8300 = vst [vmem:[#allocation12_spill] sm:$0xff] %v6257_v10  ;;  %8301 = vst [vmem:[#allocation13_spill] sm:$0xff] %v6259_v11  ;;  %v268_v18 = vand.u32 4294901760, %v6257_v10  ;;  %v896_v19 = vand.u32 4294901760, %v6259_v11  ;;  %v271_v24 = vand.u32 4294901760, %v6266_v16  ;;  %v8194_v26 = vand.u32 4294901760, %v6273_v20 }
  0x54   : > { %8302 = vst [vmem:[#allocation14_spill] sm:$0xff] %v6266_v16  ;;  %8303 = vst [vmem:[#allocation15_spill] sm:$0xff] %v6269_v17  ;;  %v8195_v25 = vand.u32 4294901760, %v6269_v17  ;;  %v8193_v27 = vand.u32 4294901760, %v6275_v21  ;;  %v6312_v33 = vmul.f32 %v220_v29, %v6296_v28  ;;  %v6321_v35 = vmul.f32 %v221_v31, %v6302_v30  ;;  %v6331_v39 = vld [vmem:[%s6225_s3 + $0x38] sm:$0xff]  ;;  %v222_v44 = vld [vmem:[%s6231_s27 + $0x30] sm:$0xff] }
  0x55   : > { %8304 = vst [vmem:[#allocation16_spill] sm:$0xff] %v6273_v20  ;;  %8305 = vst [vmem:[#allocation17_spill] sm:$0xff] %v6275_v21  ;;  %v6281_v22 = vpack.c.bf16 %v268_v18, %v265_v14  ;;  %v6287_v23 = vpack.c.bf16 %v896_v19, %v893_v15  ;;  %v6323_v36 = vmul.f32 %v220_v29, %v220_v29  ;;  %v223_v45 = vld [vmem:[%s6231_s27 + $0x38] sm:$0xff]  ;;  %v6372_v56 = vld [vmem:[%s6225_s3 + $0x40] sm:$0xff]  ;;  %v8364_v8 = vmov 0.0  }
  0x56   : > { %8306 = vst [vmem:[#allocation18_spill] sm:$0xff] %v6296_v28  ;;  %8307 = vst [vmem:[#allocation19_spill] sm:$0xff] %v6302_v30  ;;  %v6309_v32 = vpack.c.bf16 %v8195_v25, %v271_v24  ;;  %v6318_v34 = vpack.c.bf16 %v8193_v27, %v8194_v26  ;;  %v6325_v37 = vmul.f32 %v221_v31, %v221_v31  ;;  %v8192_v40 = vand.u32 4294901760, %v6312_v33  ;;  %v224_v57 = vld [vmem:[%s6231_s27 + $0x40] sm:$0xff]  ;;  %v6378_v58 = vld [vmem:[%s6225_s3 + $0x48] sm:$0xff] }
  0x57   : > { %5144 = vmatpush3.bf16.xpose.msra.mxu0 %v6281_v22  ;;  %5288 = vmatpush3.bf16.xpose.msra.mxu1 %v6287_v23  ;;  %8308 = vst [vmem:[#allocation20_spill] sm:$0xff] %v6312_v33  ;;  %8309 = vst [vmem:[#allocation21_spill] sm:$0xff] %v6321_v35  ;;  %v8189_v41 = vand.u32 4294901760, %v6321_v35  ;;  %v8188_v42 = vand.u32 4294901760, %v6323_v36  ;;  %v6344_v46 = vmul.f32 %v222_v44, %v6328_v38  ;;  %v225_v59 = vld [vmem:[%s6231_s27 + $0x48] sm:$0xff]  ;;  %v6404_v4 = vld [vmem:[%s6225_s3 + $0x50] sm:$0xff] }
  0x58   : > { %5145 = vmatprep.subr.bf16.mxu0 %v8196_v0  ;;  %5289 = vmatprep.subr.bf16.mxu1 %v8196_v0  ;;  %8310 = vst [vmem:[#allocation22_spill] sm:$0xff] %v6323_v36  ;;  %8311 = vst [vmem:[#allocation23_spill] sm:$0xff] %v6325_v37  ;;  %v8187_v43 = vand.u32 4294901760, %v6325_v37  ;;  %v6347_v47 = vmul.f32 %v223_v45, %v6331_v39  ;;  %v6361_v50 = vmul.f32 %v222_v44, %v222_v44  ;;  %v6407_v5 = vld [vmem:[%s6225_s3 + $0x58] sm:$0xff]  ;;  %v226_v44 = vld [vmem:[%s6231_s27 + $0x50] sm:$0xff] }
  0x59   : > { %8312 = vst [vmem:[#allocation24_spill] sm:$0xff] %v6328_v38  ;;  %8313 = vst [vmem:[#allocation25_spill] sm:$0xff] %v6331_v39  ;;  %v6353_v48 = vpack.c.bf16 %v8189_v41, %v8192_v40  ;;  %v6363_v51 = vmul.f32 %v223_v45, %v223_v45  ;;  %v8186_v52 = vand.u32 4294901760, %v6344_v46  ;;  %v6388_v61 = vmul.f32 %v224_v57, %v6372_v56  ;;  %v227_v45 = vld [vmem:[%s6231_s27 + $0x58] sm:$0xff] }
  0x5a   : > { %8314 = vst [vmem:[#allocation26_spill] sm:$0xff] %v6344_v46  ;;  %8315 = vst [vmem:[#allocation27_spill] sm:$0xff] %v6347_v47  ;;  %v6359_v49 = vpack.c.bf16 %v8187_v43, %v8188_v42  ;;  %v8185_v53 = vand.u32 4294901760, %v6347_v47  ;;  %v8184_v54 = vand.u32 4294901760, %v6361_v50  ;;  %v6397_v63 = vmul.f32 %v225_v59, %v6378_v58  ;;  %v6441_v43 = vld [vmem:[%s6225_s3 + $0x68] sm:$0xff] }
  0x5b   : > { %8316 = vst [vmem:[#allocation28_spill] sm:$0xff] %v6361_v50  ;;  %8317 = vst [vmem:[#allocation29_spill] sm:$0xff] %v6363_v51  ;;  %v8183_v55 = vand.u32 4294901760, %v6363_v51  ;;  %v6399_v2 = vmul.f32 %v224_v57, %v224_v57  ;;  %v6401_v3 = vmul.f32 %v225_v59, %v225_v59  ;;  %v289_v12 = vand.u32 4294901760, %v6388_v61 }
  0x5c   : > { %8318 = vst [vmem:[#allocation30_spill] sm:$0xff] %v6372_v56  ;;  %8319 = vst [vmem:[#allocation31_spill] sm:$0xff] %v6378_v58  ;;  %v6385_v60 = vpack.c.bf16 %v8185_v53, %v8186_v52  ;;  %v292_v13 = vand.u32 4294901760, %v6397_v63  ;;  %v6420_v57 = vmul.f32 %v226_v44, %v6404_v4  ;;  %v6423_v59 = vmul.f32 %v227_v45, %v6407_v5  ;;  %v6438_v52 = vld [vmem:[%s6225_s3 + $0x60] sm:$0xff] }
  0x5d   : > { %8320 = vst [vmem:[#allocation32_spill] sm:$0xff] %v6388_v61  ;;  %v6394_v62 = vpack.c.bf16 %v8183_v55, %v8184_v54  ;;  %8321 = vst [vmem:[#allocation33_spill] sm:$0xff] %v6397_v63  ;;  %v8191_v29 = vand.u32 4294901760, %v6399_v2  ;;  %v8190_v31 = vand.u32 4294901760, %v6401_v3  ;;  %v6433_v54 = vmul.f32 %v226_v44, %v226_v44 }
  0x5e   : > { %8322 = vst [vmem:[#allocation34_spill] sm:$0xff] %v6399_v2  ;;  %8323 = vst [vmem:[#allocation35_spill] sm:$0xff] %v6401_v3  ;;  %v6425_v1 = vpack.c.bf16 %v292_v13, %v289_v12  ;;  %v6435_v53 = vmul.f32 %v227_v45, %v227_v45  ;;  %v295_v42 = vand.u32 4294901760, %v6420_v57  ;;  %v298_v41 = vand.u32 4294901760, %v6423_v59  ;;  %v229_v45 = vld [vmem:[%s6231_s27 + $0x68] sm:$0xff] }
  0x5f   : > { %5147 = vmatpush3.bf16.xpose.msra.mxu0 %v6309_v32  ;;  %5291 = vmatpush3.bf16.xpose.msra.mxu1 %v6318_v34  ;;  %8324 = vst [vmem:[#allocation36_spill] sm:$0xff] %v6404_v4  ;;  %8325 = vst [vmem:[#allocation37_spill] sm:$0xff] %v6407_v5  ;;  %v6431_v55 = vpack.c.bf16 %v8190_v31, %v8191_v29  ;;  %v923_v31 = vand.u32 4294901760, %v6433_v54  ;;  %v228_v29 = vld [vmem:[%s6231_s27 + $0x60] sm:$0xff]  ;;  %v6456_v40 = vsub.f32 %v6247_v6, %v265_v14 }
  0x60   : > { %5148 = vmatprep.subr.bf16.mxu0 %v8196_v0  ;;  %5292 = vmatprep.subr.bf16.mxu1 %v8196_v0  ;;  %8326 = vst [vmem:[#allocation38_spill] sm:$0xff] %v6420_v57  ;;  %8327 = vst [vmem:[#allocation39_spill] sm:$0xff] %v6423_v59  ;;  %v926_v44 = vand.u32 4294901760, %v6435_v53  ;;  %v6461_v27 = vsub.f32 %v6257_v10, %v268_v18  ;;  %v6466_v26 = vsub.f32 %v6249_v7, %v893_v15  ;;  %v6485_v10 = vld [vmem:[%s6225_s3 + $0x70] sm:$0xff] }
  0x61   : > { %8328 = vst [vmem:[#allocation40_spill] sm:$0xff] %v6433_v54  ;;  %8329 = vst [vmem:[#allocation41_spill] sm:$0xff] %v6435_v53  ;;  %v6471_v25 = vsub.f32 %v6259_v11, %v896_v19  ;;  %v6476_v14 = vsub.f32 %v6266_v16, %v271_v24  ;;  %v6482_v18 = vmul.f32 %v229_v45, %v6441_v43  ;;  %v6496_v11 = vld [vmem:[%s6225_s3 + $0x78] sm:$0xff]  ;;  %v230_v24 = vld [vmem:[%s6231_s27 + $0x70] sm:$0xff]  ;;  %v8340_v58 = vand.u32 4294901760, %v6275_v21 }
  0x62   : > { %8330 = vst [vmem:[#allocation42_spill] sm:$0xff] %v6438_v52  ;;  %8331 = vst [vmem:[#allocation43_spill] sm:$0xff] %v6441_v43  ;;  %v6487_v15 = vpack.c.bf16 %v298_v41, %v295_v42  ;;  %v6489_v7 = vpack.c.bf16 %v926_v44, %v923_v31  ;;  %v6491_v6 = vmul.f32 %v228_v29, %v228_v29  ;;  %v231_v16 = vld [vmem:[%s6231_s27 + $0x78] sm:$0xff]  ;;  %v8339_v43 = vand.u32 4294901760, %v6273_v20 }
  0x63   : > { %8333 = vst [vmem:[#allocation45_spill] sm:$0xff] %v6482_v18  ;;  %8334 = vst [vmem:[#allocation46_spill] sm:$0xff] %v6485_v10  ;;  %v6493_v19 = vmul.f32 %v229_v45, %v229_v45  ;;  %v8341_v45 = vand.u32 4294901760, %v6312_v33  ;;  %v8342_v39 = vand.u32 4294901760, %v6321_v35  ;;  %v8352_v30 = vand.u32 4294901760, %v6399_v2 }
  0x64   : > { %8335 = vst [vmem:[#allocation47_spill] sm:$0xff] %v6491_v6  ;;  %8337 = vst [vmem:[#allocation49_spill] sm:$0xff] %v6496_v11  ;;  %v6508_v4 = vsub.f32 %v6273_v20, %v8339_v43  ;;  %v8344_v20 = vand.u32 4294901760, %v6325_v37 }
  0x65   : > { %8336 = vst [vmem:[#allocation48_spill] sm:$0xff] %v6493_v19  ;;  %v6518_v56 = vsub.f32 %v6312_v33, %v8341_v45  ;;  %v8346_v33 = vand.u32 4294901760, %v6347_v47  ;;  %v6579_v28 = vsub.f32 %v6399_v2, %v8352_v30  ;;  %v6599_v2 = vsub.f32 %v6433_v54, %v923_v31 }
  0x67   : > { %5150 = vmatpush3.bf16.xpose.msra.mxu0 %v6353_v48  ;;  %5294 = vmatpush3.bf16.xpose.msra.mxu1 %v6359_v49 }
  0x68   : > { %5151 = vmatprep.subr.bf16.mxu0 %v8196_v0  ;;  %5295 = vmatprep.subr.bf16.mxu1 %v8196_v0 }
  0x6f   : > { %5153 = vmatpush3.bf16.xpose.msra.mxu0 %v6385_v60  ;;  %5297 = vmatpush3.bf16.xpose.msra.mxu1 %v6394_v62 }
  0x70   : > { %5154 = vmatprep.subr.bf16.mxu0 %v8196_v0  ;;  %5298 = vmatprep.subr.bf16.mxu1 %v8196_v0 }
  0x77   : > { %5156 = vmatpush3.bf16.xpose.msra.mxu0 %v6425_v1  ;;  %5300 = vmatpush3.bf16.xpose.msra.mxu1 %v6431_v55 }
  0x78   : > { %5157 = vmatprep.subr.bf16.mxu0 %v8196_v0  ;;  %5301 = vmatprep.subr.bf16.mxu1 %v8196_v0  ;;  %v6479_v0 = vmul.f32 %v228_v29, %v6438_v52  ;;  %v8338_v52 = vand.u32 4294901760, %v6269_v17  ;;  %v6513_v29 = vsub.f32 %v6275_v21, %v8340_v58  ;;  %v6533_v58 = vsub.f32 %v6325_v37, %v8344_v20 }
  0x79   : > { %v8345_v21 = vand.u32 4294901760, %v6344_v46  ;;  %v6554_v20 = vmul.f32 %v231_v16, %v6496_v11  ;;  %v6568_v37 = vsub.f32 %v6388_v61, %v289_v12  ;;  %v6571_v11 = vsub.f32 %v6397_v63, %v292_v13 }
  0x7a   : > { %8332 = vst [vmem:[#allocation44_spill] sm:$0xff] %v6479_v0  ;;  %v6503_v5 = vsub.f32 %v6269_v17, %v8338_v52  ;;  %v6523_v52 = vsub.f32 %v6321_v35, %v8342_v39  ;;  %v8343_v17 = vand.u32 4294901760, %v6323_v36  ;;  %v6543_v39 = vsub.f32 %v6347_v47, %v8346_v33 }
  0x7b   : > { %v6538_v45 = vsub.f32 %v6344_v46, %v8345_v21  ;;  %v8347_v35 = vand.u32 4294901760, %v6361_v50  ;;  %8349 = vst [vmem:[#allocation51_spill] sm:$0xff] %v6554_v20  ;;  %v301_v21 = vand.u32 4294901760, %v6479_v0  ;;  %v304_v33 = vand.u32 4294901760, %v6482_v18 }
  0x7c   : > { %v6528_v43 = vsub.f32 %v6323_v36, %v8343_v17  ;;  %v6551_v36 = vmul.f32 %v230_v24, %v6485_v10  ;;  %v929_v47 = vand.u32 4294901760, %v6491_v6  ;;  %v932_v46 = vand.u32 4294901760, %v6493_v19 }
  0x7d   : > { %v6548_v17 = vsub.f32 %v6361_v50, %v8347_v35  ;;  %v8350_v35 = vand.u32 4294901760, %v6363_v51  ;;  %v8351_v10 = vmov 0.0|0.0   ;;  %v6586_v12 = vmul.f32 %v230_v24, %v230_v24 }
  0x7e   : > { %8348 = vst [vmem:[#allocation50_spill] sm:$0xff] %v6551_v36  ;;  %v6588_v13 = vmul.f32 %v231_v16, %v231_v16  ;;  %v6591_v63 = vsub.f32 %v6420_v57, %v295_v42  ;;  %v6594_v61 = vsub.f32 %v6423_v59, %v298_v41  ;;  %v307_v38 = vand.u32 4294901760, %v6551_v36 }
  0x7f   : > { %5159 = vmatpush3.bf16.xpose.msra.mxu0 %v6487_v15  ;;  %5303 = vmatpush3.bf16.xpose.msra.mxu1 %v6489_v7  ;;  %v6565_v50 = vsub.f32 %v6363_v51, %v8350_v35  ;;  %v8353_v35 = vand.u32 4294901760, %v6401_v3  ;;  %8354 = vst [vmem:[#allocation52_spill] sm:$0xff] %v6586_v12  ;;  %v310_v30 = vand.u32 4294901760, %v6554_v20  ;;  %v6601_v9 = vpack.c.bf16 %v304_v33, %v301_v21 }
  0x80   : > { %5160 = vmatprep.subr.bf16.mxu0 %v8351_v10  ;;  %5304 = vmatprep.subr.bf16.mxu1 %v8351_v10  ;;  %8355 = vst [vmem:[#allocation53_spill] sm:$0xff] %v6588_v13  ;;  %v6607_v24 = vsub.f32 %v6435_v53, %v926_v44  ;;  %v6610_v42 = vsub.f32 %v6479_v0, %v301_v21  ;;  %v935_v57 = vand.u32 4294901760, %v6586_v12  ;;  %v938_v16 = vand.u32 4294901760, %v6588_v13 }
  0x81   : > { %v6584_v51 = vsub.f32 %v6401_v3, %v8353_v35  ;;  %8356 = vst [vmem:[#allocation54_spill] sm:$0xff] %v6601_v9  ;;  %v6603_v35 = vpack.c.bf16 %v932_v46, %v929_v47  ;;  %v6613_v41 = vsub.f32 %v6482_v18, %v304_v33  ;;  %v6617_v31 = vsub.f32 %v6491_v6, %v929_v47 }
  0x82   : > { %v6620_v54 = vsub.f32 %v6493_v19, %v932_v46  ;;  %v6624_v44 = vpack.c.bf16 %v310_v30, %v307_v38  ;;  %v6627_v21 = vsub.f32 %v6551_v36, %v307_v38  ;;  %v6630_v33 = vsub.f32 %v6554_v20, %v310_v30 }
  0x83   : > { %8357 = vst [vmem:[#allocation55_spill] sm:$0xff] %v6603_v35  ;;  %v8359_v59 = vand.u32 4294901760, %v6456_v40  ;;  %v8360_v46 = vand.u32 4294901760, %v6461_v27  ;;  %v8361_v20 = vand.u32 4294901760, %v6466_v26  ;;  %v6655_v6 = vpack.c.bf16 %v938_v16, %v935_v57 }
  0x84   : > { %8358 = vst [vmem:[#allocation56_spill] sm:$0xff] %v6624_v44  ;;  %v8363_v38 = vand.u32 4294901760, %v6471_v25  ;;  %v8246_v53 = vand.u32 4294901760, %v6476_v14  ;;  %v8250_v3 = vand.u32 4294901760, %v6513_v29 }
  0x85   : > { %v354_v47 = vsub.f32 %v6456_v40, %v8359_v59  ;;  %v361_v19 = vsub.f32 %v6461_v27, %v8360_v46  ;;  %v6648_v59 = vsub.f32 %v6586_v12, %v935_v57  ;;  %v982_v36 = vsub.f32 %v6466_v26, %v8361_v20  ;;  %8362 = vst [vmem:[#allocation57_spill] sm:$0xff] %v6655_v6 }
  0x86   : > { %v6664_v12 = vsub.f32 %v6588_v13, %v938_v16  ;;  %v989_v0 = vsub.f32 %v6471_v25, %v8363_v38  ;;  %v8249_v16 = vand.u32 4294901760, %v6503_v5  ;;  %v8251_v46 = vand.u32 4294901760, %v6508_v4 }
  0x87   : > { %5162 = vmatpush3.bf16.xpose.msra.mxu0 %v6601_v9  ;;  %5306 = vmatpush3.bf16.xpose.msra.mxu1 %v6603_v35  ;;  %v355_v13 = vand.u32 4294901760, %v354_v47  ;;  %v362_v30 = vand.u32 4294901760, %v361_v19  ;;  %v983_v20 = vand.u32 4294901760, %v982_v36  ;;  %v368_v19 = vsub.f32 %v6476_v14, %v8246_v53 }
  0x88   : > { %5163 = vmatprep.subr.bf16.mxu0 %v8351_v10  ;;  %5307 = vmatprep.subr.bf16.mxu1 %v8351_v10  ;;  %v990_v18 = vand.u32 4294901760, %v989_v0  ;;  %v375_v47 = vsub.f32 %v6503_v5, %v8249_v16  ;;  %v996_v0 = vsub.f32 %v6508_v4, %v8251_v46  ;;  %v1003_v36 = vsub.f32 %v6513_v29, %v8250_v3 }
  0x89   : > { %v5167_v38 = vpack.c.bf16 %v362_v30, %v355_v13  ;;  %v8257_v16 = vand.u32 4294901760, %v6523_v52  ;;  %v8260_v30 = vand.u32 4294901760, %v6528_v43  ;;  %v8259_v35 = vand.u32 4294901760, %v6538_v45 }
  0x8a   : > { %v5311_v57 = vpack.c.bf16 %v990_v18, %v983_v20  ;;  %v376_v53 = vand.u32 4294901760, %v375_v47  ;;  %v997_v18 = vand.u32 4294901760, %v996_v0  ;;  %v1004_v13 = vand.u32 4294901760, %v1003_v36 }
  0x8b   : > { %v8258_v20 = vand.u32 4294901760, %v6533_v58  ;;  %v1010_v0 = vsub.f32 %v6528_v43, %v8260_v30 }
  0x8c   : > { %v5314_v47 = vpack.c.bf16 %v1004_v13, %v997_v18  ;;  %v396_v18 = vsub.f32 %v6538_v45, %v8259_v35  ;;  %v8265_v35 = vand.u32 4294901760, %v6571_v11 }
  0x8d   : > { %v1017_v36 = vsub.f32 %v6533_v58, %v8258_v20  ;;  %v1011_v9 = vand.u32 4294901760, %v1010_v0  ;;  %v8263_v20 = vand.u32 4294901760, %v6568_v37 }
  0x8e   : > { %v397_v0 = vand.u32 4294901760, %v396_v18 }
  0x8f   : > { %5165 = vmatpush3.bf16.xpose.msra.mxu0 %v6624_v44  ;;  %5309 = vmatpush3.bf16.xpose.msra.mxu1 %v6655_v6  ;;  %v369_v6 = vand.u32 4294901760, %v368_v19  ;;  %v8254_v44 = vand.u32 4294901760, %v6518_v56 }
  0x90   : > { %5166 = vmatprep.subr.bf16.mxu0 %v8351_v10  ;;  %5310 = vmatprep.subr.bf16.mxu1 %v8351_v10 }
  0x91   : > { %v5170_v19 = vpack.c.bf16 %v376_v53, %v369_v6  ;;  %v8264_v6 = vand.u32 4294901760, %v6548_v17  ;;  %v8262_v53 = vand.u32 4294901760, %v6565_v50 }
  0x96   : > { %4125 = vmatmul.mubr.f32.vlgmr.msra.gmra.mrb[0].mxu0 %v8364_v8  ;;  %4335 = vmatmul.mubr.f32.vlgmr.msra.gmra.mrb[0].mxu1 %v8364_v8 }
  0x97   : > { %5168 = vmatpush3.bf16.xpose.msra.mxu0 %v5167_v38  ;;  %5312 = vmatpush3.bf16.xpose.msra.mxu1 %v5311_v57  ;;  %v382_v57 = vsub.f32 %v6518_v56, %v8254_v44  ;;  %v389_v38 = vsub.f32 %v6523_v52, %v8257_v16  ;;  %v8261_v44 = vand.u32 4294901760, %v6543_v39  ;;  %v1018_v16 = vand.u32 4294901760, %v1017_v36 }
  0x98   : > { %5169 = vmatprep.subr.bf16.mxu0 %v8351_v10  ;;  %5313 = vmatprep.subr.bf16.mxu1 %v8351_v10 }
  0x99   : > { %4159 = vmatprep.mubr.msk.f32.mxu0 %vm6065_vm0, %v8364_v8  ;;  %4369 = vmatprep.mubr.msk.f32.mxu1 %vm6065_vm0, %v8364_v8  ;;  %v383_v3 = vand.u32 4294901760, %v382_v57  ;;  %v390_v46 = vand.u32 4294901760, %v389_v38  ;;  %v403_v13 = vsub.f32 %v6543_v39, %v8261_v44  ;;  %v5317_v38 = vpack.c.bf16 %v1018_v16, %v1011_v9 }
  0x9a   : > { %v8268_v9 = vand.u32 4294901760, %v6579_v28  ;;  %v417_v16 = vsub.f32 %v6571_v11, %v8265_v35 }
  0x9b   : > { %v5173_v57 = vpack.c.bf16 %v390_v46, %v383_v3  ;;  %v404_v36 = vand.u32 4294901760, %v403_v13  ;;  %v8266_v3 = vand.u32 4294901760, %v6584_v51  ;;  %v410_v46 = vsub.f32 %v6568_v37, %v8263_v20 }
  0x9c   : > { %v8269_v20 = vand.u32 4294901760, %v6594_v61 }
  0x9d   : > { %v5176_v18 = vpack.c.bf16 %v404_v36, %v397_v0 }
  0x9e   : > { %v431_v36 = vsub.f32 %v6594_v61, %v8269_v20 }
  0x9f   : > { %5171 = vmatpush3.bf16.xpose.msra.mxu0 %v5170_v19  ;;  %5315 = vmatpush3.bf16.xpose.msra.mxu1 %v5314_v47  ;;  %v1024_v19 = vsub.f32 %v6548_v17, %v8264_v6  ;;  %v1031_v47 = vsub.f32 %v6565_v50, %v8262_v53  ;;  %v8267_v53 = vand.u32 4294901760, %v6591_v63 }
  0xa0   : > { %5172 = vmatprep.subr.bf16.mxu0 %v8351_v10  ;;  %5316 = vmatprep.subr.bf16.mxu1 %v8351_v10 }
  0xa1   : > { %v1025_v30 = vand.u32 4294901760, %v1024_v19  ;;  %v1032_v44 = vand.u32 4294901760, %v1031_v47  ;;  %v411_v19 = vand.u32 4294901760, %v410_v46  ;;  %v418_v47 = vand.u32 4294901760, %v417_v16 }
  0xa2   : > { %v424_v0 = vsub.f32 %v6591_v63, %v8267_v53  ;;  %v8273_v53 = vand.u32 4294901760, %v6613_v41 }
  0xa3   : > { %v5320_v13 = vpack.c.bf16 %v1032_v44, %v1025_v30  ;;  %v8272_v44 = vand.u32 4294901760, %v6599_v2  ;;  %v8270_v30 = vand.u32 4294901760, %v6607_v24  ;;  %v5179_v46 = vpack.c.bf16 %v418_v47, %v411_v19 }
  0xa4   : > { %v445_v47 = vsub.f32 %v6613_v41, %v8273_v53 }
  0xa7   : > { %5174 = vmatpush3.bf16.xpose.msra.mxu0 %v5173_v57  ;;  %5318 = vmatpush3.bf16.xpose.msra.mxu1 %v5317_v38  ;;  %v1038_v57 = vsub.f32 %v6579_v28, %v8268_v9  ;;  %v1045_v38 = vsub.f32 %v6584_v51, %v8266_v3  ;;  %v8271_v3 = vand.u32 4294901760, %v6610_v42 }
  0xa8   : > { %5175 = vmatprep.subr.bf16.mxu0 %v8351_v10  ;;  %5319 = vmatprep.subr.bf16.mxu1 %v8351_v10 }
  0xa9   : > { %v1039_v6 = vand.u32 4294901760, %v1038_v57  ;;  %v1046_v35 = vand.u32 4294901760, %v1045_v38  ;;  %v425_v57 = vand.u32 4294901760, %v424_v0  ;;  %v432_v38 = vand.u32 4294901760, %v431_v36 }
  0xaa   : > { %v438_v19 = vsub.f32 %v6610_v42, %v8271_v3  ;;  %v458_v3 = vand.u32 4294901760, %v6630_v33 }
  0xab   : > { %v5323_v16 = vpack.c.bf16 %v1046_v35, %v1039_v6  ;;  %v1065_v35 = vand.u32 4294901760, %v6617_v31  ;;  %v1072_v6 = vand.u32 4294901760, %v6620_v54  ;;  %v5182_v0 = vpack.c.bf16 %v432_v38, %v425_v57 }
  0xaf   : > { %5177 = vmatpush3.bf16.xpose.msra.mxu0 %v5176_v18  ;;  %5321 = vmatpush3.bf16.xpose.msra.mxu1 %v5320_v13  ;;  %v1052_v18 = vsub.f32 %v6599_v2, %v8272_v44  ;;  %v1059_v13 = vsub.f32 %v6607_v24, %v8270_v30  ;;  %v451_v30 = vand.u32 4294901760, %v6627_v21 }
  0xb0   : > { %5178 = vmatprep.subr.bf16.mxu0 %v8351_v10  ;;  %5322 = vmatprep.subr.bf16.mxu1 %v8351_v10 }
  0xb1   : > { %v1053_v9 = vand.u32 4294901760, %v1052_v18  ;;  %v1060_v20 = vand.u32 4294901760, %v1059_v13  ;;  %v439_v18 = vand.u32 4294901760, %v438_v19  ;;  %v446_v13 = vand.u32 4294901760, %v445_v47 }
  0xb2   : > { %v452_v38 = vsub.f32 %v6627_v21, %v451_v30  ;;  %v459_v47 = vsub.f32 %v6630_v33, %v458_v3 }
  0xb3   : > { %v5326_v36 = vpack.c.bf16 %v1060_v20, %v1053_v9  ;;  %v8274_v20 = vand.u32 4294901760, %v6648_v59  ;;  %v1086_v9 = vand.u32 4294901760, %v6664_v12  ;;  %v5185_v57 = vpack.c.bf16 %v446_v13, %v439_v18 }
  0xb7   : > { %5180 = vmatpush3.bf16.xpose.msra.mxu0 %v5179_v46  ;;  %5324 = vmatpush3.bf16.xpose.msra.mxu1 %v5323_v16  ;;  %v1066_v46 = vsub.f32 %v6617_v31, %v1065_v35  ;;  %v1073_v16 = vsub.f32 %v6620_v54, %v1072_v6 }
  0xb8   : > { %5181 = vmatprep.subr.bf16.mxu0 %v8351_v10  ;;  %5325 = vmatprep.subr.bf16.mxu1 %v8351_v10 }
  0xb9   : > { %v1067_v44 = vand.u32 4294901760, %v1066_v46  ;;  %v1074_v53 = vand.u32 4294901760, %v1073_v16  ;;  %v453_v46 = vand.u32 4294901760, %v452_v38  ;;  %v460_v16 = vand.u32 4294901760, %v459_v47 }
  0xba   : > { %v8366_v38 = vpack.c.bf16 %v6471_v25, %v6466_v26  ;;  %v8368_v47 = vpack.c.bf16 %v6513_v29, %v6508_v4 }
  0xbb   : > { %v5329_v19 = vpack.c.bf16 %v1074_v53, %v1067_v44  ;;  %v5188_v53 = vpack.c.bf16 %v460_v16, %v453_v46  ;;  %v8371_v46 = vpack.c.bf16 %v6543_v39, %v6538_v45  ;;  %v8372_v16 = vpack.c.bf16 %v6565_v50, %v6548_v17 }
  0xbf   : > { %5183 = vmatpush3.bf16.xpose.msra.mxu0 %v5182_v0  ;;  %5327 = vmatpush3.bf16.xpose.msra.mxu1 %v5326_v36  ;;  %v1080_v0 = vsub.f32 %v6648_v59, %v8274_v20  ;;  %v1087_v36 = vsub.f32 %v6664_v12, %v1086_v9  ;;  %v8277_v20 = vmov 1.0  }
  0xc0   : > { %5184 = vmatprep.subr.bf16.mxu0 %v8351_v10  ;;  %5328 = vmatprep.subr.bf16.mxu1 %v8351_v10 }
  0xc1   : > { %v1081_v18 = vand.u32 4294901760, %v1080_v0  ;;  %v1088_v13 = vand.u32 4294901760, %v1087_v36  ;;  %v8369_v0 = vpack.c.bf16 %v6523_v52, %v6518_v56  ;;  %v8370_v36 = vpack.c.bf16 %v6533_v58, %v6528_v43 }
  0xc3   : > { %v5332_v44 = vpack.c.bf16 %v1088_v13, %v1081_v18  ;;  %v8373_v18 = vpack.c.bf16 %v6571_v11, %v6568_v37  ;;  %v8374_v13 = vpack.c.bf16 %v6584_v51, %v6579_v28 }
  0xc7   : > { %5186 = vmatpush3.bf16.xpose.msra.mxu0 %v5185_v57  ;;  %5330 = vmatpush3.bf16.xpose.msra.mxu1 %v5329_v19  ;;  %v8365_v57 = vpack.c.bf16 %v6461_v27, %v6456_v40  ;;  %v8367_v19 = vpack.c.bf16 %v6503_v5, %v6476_v14 }
  0xc8   : > { %5187 = vmatprep.subr.bf16.mxu0 %v8351_v10  ;;  %5331 = vmatprep.subr.bf16.mxu1 %v8351_v10 }
  0xcf   : > { %5189 = vmatpush3.bf16.xpose.msra.mxu0 %v5188_v53  ;;  %5333 = vmatpush3.bf16.xpose.msra.mxu1 %v5332_v44  ;;  %v8375_v53 = vpack.c.bf16 %v6594_v61, %v6591_v63  ;;  %v8376_v44 = vpack.c.bf16 %v6607_v24, %v6599_v2 }
  0xd0   : > { %5190 = vmatprep.subr.bf16.mxu0 %v8351_v10  ;;  %5334 = vmatprep.subr.bf16.mxu1 %v8351_v10 }
  0xd6   : > { %4160 = vmatmul.mubr.f32.vlgmr.msra.gmra.mrb[0].mxu0 %v8277_v20  ;;  %4370 = vmatmul.mubr.f32.vlgmr.msra.gmra.mrb[0].mxu1 %v8277_v20 }
  0xd7   : > { %5192 = vmatpush3.bf16.xpose.msra.mxu0 %v8365_v57  ;;  %5336 = vmatpush3.bf16.xpose.msra.mxu1 %v8366_v38  ;;  %v8377_v57 = vpack.c.bf16 %v6613_v41, %v6610_v42  ;;  %v8378_v38 = vpack.c.bf16 %v6620_v54, %v6617_v31 }
  0xd8   : > { %5193 = vmatprep.subr.bf16.mxu0 %v8351_v10  ;;  %5337 = vmatprep.subr.bf16.mxu1 %v8351_v10 }
  0xd9   : > { %4194 = vmatprep.mubr.msk.f32.mxu0 %vm6065_vm0, %v8364_v8  ;;  %4404 = vmatprep.mubr.msk.f32.mxu1 %vm6065_vm0, %v8364_v8 }
  0xdf   : > { %5195 = vmatpush3.bf16.xpose.msra.mxu0 %v8367_v19  ;;  %5339 = vmatpush3.bf16.xpose.msra.mxu1 %v8368_v47  ;;  %v8379_v19 = vpack.c.bf16 %v6630_v33, %v6627_v21  ;;  %v8380_v47 = vpack.c.bf16 %v6664_v12, %v6648_v59 }
  0xe0   : > { %5196 = vmatprep.subr.bf16.mxu0 %v8351_v10  ;;  %5340 = vmatprep.subr.bf16.mxu1 %v8351_v10 }
  0xe7   : > { %5198 = vmatpush3.bf16.xpose.msra.mxu0 %v8369_v0  ;;  %5342 = vmatpush3.bf16.xpose.msra.mxu1 %v8370_v36  ;;  %v8381_v0 = vld [vmem:[#allocation54_spill] sm:$0xff]  ;;  %v8382_v36 = vld [vmem:[#allocation55_spill] sm:$0xff] }
  0xe8   : > { %5199 = vmatprep.subr.bf16.mxu0 %v8351_v10  ;;  %5343 = vmatprep.subr.bf16.mxu1 %v8351_v10 }
  0xef   : > { %5201 = vmatpush3.bf16.xpose.msra.mxu0 %v8371_v46  ;;  %5345 = vmatpush3.bf16.xpose.msra.mxu1 %v8372_v16  ;;  %v8383_v46 = vld [vmem:[#allocation56_spill] sm:$0xff]  ;;  %v8384_v16 = vld [vmem:[#allocation57_spill] sm:$0xff] }
  0xf0   : > { %5202 = vmatprep.subr.bf16.mxu0 %v8351_v10  ;;  %5346 = vmatprep.subr.bf16.mxu1 %v8351_v10 }
  0xf7   : > { %5204 = vmatpush3.bf16.xpose.msra.mxu0 %v8373_v18  ;;  %5348 = vmatpush3.bf16.xpose.msra.mxu1 %v8374_v13  ;;  %v8385_v18 = vand.u32 4294901760, %v6456_v40  ;;  %v8386_v13 = vand.u32 4294901760, %v6461_v27  ;;  %v8391_v40 = vand.u32 4294901760, %v6508_v4  ;;  %v8397_v4 = vand.u32 4294901760, %v6538_v45 }
  0xf8   : > { %5205 = vmatprep.subr.bf16.mxu0 %v8351_v10  ;;  %5349 = vmatprep.subr.bf16.mxu1 %v8351_v10  ;;  %v8403_v45 = vand.u32 4294901760, %v6579_v28  ;;  %v8409_v28 = vand.u32 4294901760, %v6610_v42  ;;  %v8412_v42 = vld [vmem:[#allocation10_spill] sm:$0xff] }
  0xf9   : > { %v7021_v54 = vmul.f32 %v8412_v42, %v8412_v42  ;;  %v5959_v42 = vld [vmem:[%s6225_s3 + $0x8] sm:$0xff] }
  0xfb   : > { %v1543_v21 = vand.u32 4294901760, %v7021_v54 }
  0xfd   : > { %v7034_v12 = vsub.f32 %v7021_v54, %v1543_v21 }
  0xff   : > { %5207 = vmatpush3.bf16.xpose.msra.mxu0 %v8375_v53  ;;  %5351 = vmatpush3.bf16.xpose.msra.mxu1 %v8376_v44  ;;  %v5239_v53 = vpack.c.bf16 %v8386_v13, %v8385_v18  ;;  %v8387_v44 = vand.u32 4294901760, %v6466_v26  ;;  %v8389_v26 = vand.u32 4294901760, %v6476_v14  ;;  %v8393_v18 = vand.u32 4294901760, %v6518_v56 }
 0x100   : > { %5208 = vmatprep.subr.bf16.mxu0 %v8351_v10  ;;  %5352 = vmatprep.subr.bf16.mxu1 %v8351_v10  ;;  %v8394_v13 = vand.u32 4294901760, %v6523_v52  ;;  %v8395_v14 = vand.u32 4294901760, %v6528_v43  ;;  %v8399_v56 = vand.u32 4294901760, %v6548_v17  ;;  %v8400_v52 = vand.u32 4294901760, %v6565_v50 }
 0x101   : > { %v8401_v43 = vand.u32 4294901760, %v6568_v37  ;;  %v8405_v50 = vand.u32 4294901760, %v6591_v63  ;;  %v8406_v17 = vand.u32 4294901760, %v6594_v61  ;;  %v8407_v37 = vand.u32 4294901760, %v6599_v2 }
 0x102   : > { %v5401_v61 = vpack.c.bf16 %v1072_v6, %v1065_v35  ;;  %v5260_v63 = vpack.c.bf16 %v458_v3, %v451_v30  ;;  %v8411_v2 = vand.u32 4294901760, %v6648_v59  ;;  %v8414_v3 = vld [vmem:[#allocation18_spill] sm:$0xff]  ;;  %v8415_v35 = vld [vmem:[#allocation19_spill] sm:$0xff] }
 0x103   : > { %v7045_v30 = vmul.f32 %v8414_v3, %v8414_v3  ;;  %v7049_v6 = vmul.f32 %v8415_v35, %v8415_v35  ;;  %v8424_v3 = vld [vmem:[#allocation46_spill] sm:$0xff] }
 0x104   : > { %v7181_v35 = vmul.f32 %v8424_v3, %v8424_v3 }
 0x107   : > { %5210 = vmatpush3.bf16.xpose.msra.mxu0 %v8377_v57  ;;  %5354 = vmatpush3.bf16.xpose.msra.mxu1 %v8378_v38  ;;  %v8388_v57 = vand.u32 4294901760, %v6471_v25  ;;  %v8390_v25 = vand.u32 4294901760, %v6503_v5  ;;  %v8396_v5 = vand.u32 4294901760, %v6533_v58  ;;  %v8402_v58 = vand.u32 4294901760, %v6571_v11 }
 0x108   : > { %5211 = vmatprep.subr.bf16.mxu0 %v8351_v10  ;;  %5355 = vmatprep.subr.bf16.mxu1 %v8351_v10  ;;  %v8408_v11 = vand.u32 4294901760, %v6607_v24  ;;  %v5404_v24 = vpack.c.bf16 %v1086_v9, %v8411_v2  ;;  %v5958_v2 = vld [vmem:[%s6225_s3] sm:$0xff] }
 0x109   : > { %v5383_v38 = vpack.c.bf16 %v8388_v57, %v8387_v44  ;;  %v5242_v27 = vpack.c.bf16 %v8390_v25, %v8389_v26  ;;  %v5389_v44 = vpack.c.bf16 %v8396_v5, %v8395_v14  ;;  %v5251_v26 = vpack.c.bf16 %v8402_v58, %v8401_v43  ;;  %v8417_v14 = vld [vmem:[#allocation25_spill] sm:$0xff] }
 0x10a   : > { %v7079_v5 = vmul.f32 %v8417_v14, %v8417_v14 }
 0x10f   : > { %5213 = vmatpush3.bf16.xpose.msra.mxu0 %v8379_v19  ;;  %5357 = vmatpush3.bf16.xpose.msra.mxu1 %v8380_v47  ;;  %v8392_v19 = vand.u32 4294901760, %v6513_v29  ;;  %v8398_v29 = vand.u32 4294901760, %v6543_v39  ;;  %v8404_v39 = vand.u32 4294901760, %v6584_v51  ;;  %v8410_v51 = vand.u32 4294901760, %v6613_v41  ;;  %v8413_v41 = vld [vmem:[#allocation11_spill] sm:$0xff] }
 0x110   : > { %5214 = vmatprep.subr.bf16.mxu0 %v8351_v10  ;;  %5358 = vmatprep.subr.bf16.mxu1 %v8351_v10  ;;  %v7025_v31 = vmul.f32 %v8413_v41, %v8413_v41  ;;  %v1521_v41 = vmul.f32 %v5959_v42, %v5959_v42 }
 0x111   : > { %v5386_v47 = vpack.c.bf16 %v8392_v19, %v8391_v40  ;;  %v5248_v57 = vpack.c.bf16 %v8398_v29, %v8397_v4  ;;  %v5395_v25 = vpack.c.bf16 %v8404_v39, %v8403_v45  ;;  %v5398_v40 = vpack.c.bf16 %v8408_v11, %v8407_v37 }
 0x112   : > { %v5257_v19 = vpack.c.bf16 %v8410_v51, %v8409_v28  ;;  %v1546_v33 = vand.u32 4294901760, %v7025_v31  ;;  %v1558_v29 = vand.u32 4294901760, %v7079_v5  ;;  %v8423_v28 = vld [vmem:[#allocation43_spill] sm:$0xff] }
 0x113   : > { %v7157_v51 = vmul.f32 %v8423_v28, %v8423_v28 }
 0x114   : > { %v7041_v59 = vsub.f32 %v7025_v31, %v1546_v33 }
 0x116   : > { %4195 = vmatmul.mubr.f32.vlgmr.msra.gmra.mrb[0].mxu0 %v8364_v8  ;;  %4405 = vmatmul.mubr.f32.vlgmr.msra.gmra.mrb[0].mxu1 %v8364_v8  ;;  %v5482_v9 = vpack.c.bf16 %v7041_v59, %v7034_v12 }
 0x117   : > { %5216 = vmatpush3.bf16.xpose.msra.mxu0 %v6281_v22  ;;  %5360 = vmatpush3.bf16.xpose.msra.mxu1 %v6287_v23 }
 0x118   : > { %5217 = vmatprep.subr.bf16.mxu0 %v8351_v10  ;;  %5361 = vmatprep.subr.bf16.mxu1 %v8351_v10 }
 0x119   : > { %4229 = vmatprep.mubr.msk.f32.mxu0 %vm6065_vm0, %v8364_v8  ;;  %4439 = vmatprep.mubr.msk.f32.mxu1 %vm6065_vm0, %v8364_v8 }
 0x11f   : > { %5219 = vmatpush3.bf16.xpose.msra.mxu0 %v6309_v32  ;;  %5363 = vmatpush3.bf16.xpose.msra.mxu1 %v6318_v34 }
 0x120   : > { %5220 = vmatprep.subr.bf16.mxu0 %v8351_v10  ;;  %5364 = vmatprep.subr.bf16.mxu1 %v8351_v10 }
 0x127   : > { %5222 = vmatpush3.bf16.xpose.msra.mxu0 %v6353_v48  ;;  %5366 = vmatpush3.bf16.xpose.msra.mxu1 %v6359_v49 }
 0x128   : > { %5223 = vmatprep.subr.bf16.mxu0 %v8351_v10  ;;  %5367 = vmatprep.subr.bf16.mxu1 %v8351_v10 }
 0x12f   : > { %5225 = vmatpush3.bf16.xpose.msra.mxu0 %v6385_v60  ;;  %5369 = vmatpush3.bf16.xpose.msra.mxu1 %v6394_v62 }
 0x130   : > { %5226 = vmatprep.subr.bf16.mxu0 %v8351_v10  ;;  %5370 = vmatprep.subr.bf16.mxu1 %v8351_v10 }
 0x137   : > { %5228 = vmatpush3.bf16.xpose.msra.mxu0 %v6425_v1  ;;  %5372 = vmatpush3.bf16.xpose.msra.mxu1 %v6431_v55 }
 0x138   : > { %5229 = vmatprep.subr.bf16.mxu0 %v8351_v10  ;;  %5373 = vmatprep.subr.bf16.mxu1 %v8351_v10 }
 0x13f   : > { %5231 = vmatpush3.bf16.xpose.msra.mxu0 %v6487_v15  ;;  %5375 = vmatpush3.bf16.xpose.msra.mxu1 %v6489_v7 }
 0x140   : > { %5232 = vmatprep.subr.bf16.mxu0 %v8351_v10  ;;  %5376 = vmatprep.subr.bf16.mxu1 %v8351_v10 }
 0x147   : > { %5234 = vmatpush3.bf16.xpose.msra.mxu0 %v8381_v0  ;;  %5378 = vmatpush3.bf16.xpose.msra.mxu1 %v8382_v36 }
 0x148   : > { %5235 = vmatprep.subr.bf16.mxu0 %v8351_v10  ;;  %5379 = vmatprep.subr.bf16.mxu1 %v8351_v10 }
 0x14f   : > { %5237 = vmatpush3.bf16.xpose.msra.mxu0 %v8383_v46  ;;  %5381 = vmatpush3.bf16.xpose.msra.mxu1 %v8384_v16 }
 0x150   : > { %5238 = vmatprep.subr.bf16.mxu0 %v8351_v10  ;;  %5382 = vmatprep.subr.bf16.mxu1 %v8351_v10 }
 0x156   : > { %4230 = vmatmul.mubr.f32.vlgmr.msra.gmra.mrb[0].mxu0 %v8364_v8  ;;  %4440 = vmatmul.mubr.f32.vlgmr.msra.gmra.mrb[0].mxu1 %v8364_v8 }
 0x157   : > { %5240 = vmatpush3.bf16.xpose.msra.mxu0 %v5239_v53  ;;  %5384 = vmatpush3.bf16.xpose.msra.mxu1 %v5383_v38  ;;  %v5245_v53 = vpack.c.bf16 %v8394_v13, %v8393_v18  ;;  %v5392_v38 = vpack.c.bf16 %v8400_v52, %v8399_v56  ;;  %v1552_v18 = vand.u32 4294901760, %v7049_v6  ;;  %v8416_v13 = vld [vmem:[#allocation24_spill] sm:$0xff]  ;;  %v8419_v52 = vld [vmem:[#allocation31_spill] sm:$0xff] }
 0x158   : > { %5241 = vmatprep.subr.bf16.mxu0 %v8351_v10  ;;  %5385 = vmatprep.subr.bf16.mxu1 %v8351_v10 }
 0x159   : > { %4264 = vmatprep.mubr.msk.f32.mxu0 %vm6065_vm0, %v8364_v8  ;;  %4474 = vmatprep.mubr.msk.f32.mxu1 %vm6065_vm0, %v8364_v8 }
 0x15f   : > { %5243 = vmatpush3.bf16.xpose.msra.mxu0 %v5242_v27  ;;  %5387 = vmatpush3.bf16.xpose.msra.mxu1 %v5386_v47  ;;  %v5254_v27 = vpack.c.bf16 %v8406_v17, %v8405_v50  ;;  %v1549_v47 = vand.u32 4294901760, %v7045_v30 }
 0x160   : > { %5244 = vmatprep.subr.bf16.mxu0 %v8351_v10  ;;  %5388 = vmatprep.subr.bf16.mxu1 %v8351_v10 }
 0x167   : > { %5246 = vmatpush3.bf16.xpose.msra.mxu0 %v5245_v53  ;;  %5390 = vmatpush3.bf16.xpose.msra.mxu1 %v5389_v44  ;;  %v7075_v53 = vmul.f32 %v8416_v13, %v8416_v13  ;;  %v8425_v13 = vld [vmem:[#allocation49_spill] sm:$0xff] }
 0x168   : > { %5247 = vmatprep.subr.bf16.mxu0 %v8351_v10  ;;  %5391 = vmatprep.subr.bf16.mxu1 %v8351_v10  ;;  %v7185_v14 = vmul.f32 %v8425_v13, %v8425_v13 }
 0x169   : > { %v1555_v4 = vand.u32 4294901760, %v7075_v53 }
 0x16f   : > { %5249 = vmatpush3.bf16.xpose.msra.mxu0 %v5248_v57  ;;  %5393 = vmatpush3.bf16.xpose.msra.mxu1 %v5392_v38  ;;  %v7092_v57 = vsub.f32 %v7075_v53, %v1555_v4  ;;  %v7105_v38 = vmul.f32 %v8419_v52, %v8419_v52  ;;  %v1540_v52 = vand.u32 4294901760, %v1521_v41 }
 0x170   : > { %5250 = vmatprep.subr.bf16.mxu0 %v8351_v10  ;;  %5394 = vmatprep.subr.bf16.mxu1 %v8351_v10 }
 0x171   : > { %v1667_v54 = vand.u32 4294901760, %v7092_v57 }
 0x177   : > { %5252 = vmatpush3.bf16.xpose.msra.mxu0 %v5251_v26  ;;  %5396 = vmatpush3.bf16.xpose.msra.mxu1 %v5395_v25  ;;  %v1564_v26 = vand.u32 4294901760, %v7105_v38  ;;  %v8421_v25 = vld [vmem:[#allocation37_spill] sm:$0xff] }
 0x178   : > { %5253 = vmatprep.subr.bf16.mxu0 %v8351_v10  ;;  %5397 = vmatprep.subr.bf16.mxu1 %v8351_v10  ;;  %v7131_v50 = vmul.f32 %v8421_v25, %v8421_v25  ;;  %v1579_v25 = vand.u32 4294901760, %v7181_v35 }
 0x17a   : > { %v1570_v37 = vand.u32 4294901760, %v7131_v50 }
 0x17f   : > { %5255 = vmatpush3.bf16.xpose.msra.mxu0 %v5254_v27  ;;  %5399 = vmatpush3.bf16.xpose.msra.mxu1 %v5398_v40 }
 0x180   : > { %5256 = vmatprep.subr.bf16.mxu0 %v8351_v10  ;;  %5400 = vmatprep.subr.bf16.mxu1 %v8351_v10 }
 0x187   : > { %5258 = vmatpush3.bf16.xpose.msra.mxu0 %v5257_v19  ;;  %5402 = vmatpush3.bf16.xpose.msra.mxu1 %v5401_v61  ;;  %v1646_v19 = vand.u32 4294901760, %v7041_v59 }
 0x188   : > { %5259 = vmatprep.subr.bf16.mxu0 %v8351_v10  ;;  %5403 = vmatprep.subr.bf16.mxu1 %v8351_v10 }
 0x18f   : > { %5261 = vmatpush3.bf16.xpose.msra.mxu0 %v5260_v63  ;;  %5405 = vmatpush3.bf16.xpose.msra.mxu1 %v5404_v24  ;;  %v1576_v63 = vand.u32 4294901760, %v7157_v51  ;;  %v1520_v24 = vmul.f32 %v5958_v2, %v5958_v2  ;;  %v7197_v2 = vsub.f32 %v1521_v41, %v1540_v52 }
 0x190   : > { %5262 = vmatprep.subr.bf16.mxu0 %v8351_v10  ;;  %5406 = vmatprep.subr.bf16.mxu1 %v8351_v10 }
 0x196   : > { %4265 = vmatmul.mubr.f32.vlgmr.msra.gmra.mrb[0].mxu0 %v8277_v20  ;;  %4475 = vmatmul.mubr.f32.vlgmr.msra.gmra.mrb[0].mxu1 %v8277_v20 }
 0x197   : > { %5264 = vmatpush3.bf16.xpose.msra.mxu0 %v6281_v22  ;;  %5408 = vmatpush3.bf16.xpose.msra.mxu1 %v6287_v23  ;;  %v7066_v22 = vsub.f32 %v7045_v30, %v1549_v47  ;;  %v7071_v23 = vsub.f32 %v7049_v6, %v1552_v18 }
 0x198   : > { %5265 = vmatprep.subr.bf16.mxu0 %v8351_v10  ;;  %5409 = vmatprep.subr.bf16.mxu1 %v8351_v10 }
 0x199   : > { %4299 = vmatprep.mubr.msk.f32.mxu0 %vm6065_vm0, %v8364_v8  ;;  %4509 = vmatprep.mubr.msk.f32.mxu1 %vm6065_vm0, %v8364_v8  ;;  %v5485_v44 = vpack.c.bf16 %v7071_v23, %v7066_v22 }
 0x19f   : > { %5267 = vmatpush3.bf16.xpose.msra.mxu0 %v6309_v32  ;;  %5411 = vmatpush3.bf16.xpose.msra.mxu1 %v6318_v34  ;;  %v7097_v32 = vsub.f32 %v7079_v5, %v1558_v29  ;;  %v8418_v34 = vld [vmem:[#allocation30_spill] sm:$0xff] }
 0x1a0   : > { %5268 = vmatprep.subr.bf16.mxu0 %v8351_v10  ;;  %5412 = vmatprep.subr.bf16.mxu1 %v8351_v10  ;;  %v7101_v56 = vmul.f32 %v8418_v34, %v8418_v34  ;;  %v1537_v34 = vand.u32 4294901760, %v1520_v24 }
 0x1a1   : > { %v5488_v43 = vpack.c.bf16 %v7097_v32, %v7092_v57  ;;  %v1674_v31 = vand.u32 4294901760, %v7097_v32 }
 0x1a2   : > { %v1561_v58 = vand.u32 4294901760, %v7101_v56  ;;  %v7195_v28 = vsub.f32 %v1520_v24, %v1537_v34  ;;  %v8276_v24 = vand.u32 4294901760, %v7197_v2  ;;  %v7229_v41 = vpack.c.bf16 %v1540_v52, %v1537_v34 }
 0x1a3   : > { %v1653_v34 = vand.u32 4294901760, %v7066_v22  ;;  %v1660_v52 = vand.u32 4294901760, %v7071_v23 }
 0x1a4   : > { %v7118_v45 = vsub.f32 %v7101_v56, %v1561_v58  ;;  %v8275_v42 = vand.u32 4294901760, %v7195_v28 }
 0x1a6   : > { %v1626_v3 = vsub.f32 %v7195_v28, %v8275_v42  ;;  %v1681_v30 = vand.u32 4294901760, %v7118_v45 }
 0x1a7   : > { %5270 = vmatpush3.bf16.xpose.msra.mxu0 %v6353_v48  ;;  %5414 = vmatpush3.bf16.xpose.msra.mxu1 %v6359_v49  ;;  %v7123_v48 = vsub.f32 %v7105_v38, %v1564_v26  ;;  %v8420_v49 = vld [vmem:[#allocation36_spill] sm:$0xff] }
 0x1a8   : > { %5271 = vmatprep.subr.bf16.mxu0 %v8351_v10  ;;  %5415 = vmatprep.subr.bf16.mxu1 %v8351_v10  ;;  %v7127_v39 = vmul.f32 %v8420_v49, %v8420_v49  ;;  %v1639_v49 = vand.u32 4294901760, %v7034_v12 }
 0x1a9   : > { %v5491_v17 = vpack.c.bf16 %v7123_v48, %v7118_v45  ;;  %v1688_v6 = vand.u32 4294901760, %v7123_v48 }
 0x1aa   : > { %v1567_v27 = vand.u32 4294901760, %v7127_v39 }
 0x1ac   : > { %v7144_v11 = vsub.f32 %v7127_v39, %v1567_v27 }
 0x1ae   : > { %v1695_v53 = vand.u32 4294901760, %v7144_v11 }
 0x1af   : > { %5273 = vmatpush3.bf16.xpose.msra.mxu0 %v6385_v60  ;;  %5417 = vmatpush3.bf16.xpose.msra.mxu1 %v6394_v62  ;;  %v7149_v60 = vsub.f32 %v7131_v50, %v1570_v37  ;;  %v8422_v62 = vld [vmem:[#allocation42_spill] sm:$0xff] }
 0x1b0   : > { %5274 = vmatprep.subr.bf16.mxu0 %v8351_v10  ;;  %5418 = vmatprep.subr.bf16.mxu1 %v8351_v10  ;;  %v7153_v40 = vmul.f32 %v8422_v62, %v8422_v62  ;;  %v1582_v62 = vand.u32 4294901760, %v7185_v14 }
 0x1b1   : > { %v1702_v5 = vand.u32 4294901760, %v7149_v60 }
 0x1b2   : > { %v1573_v61 = vand.u32 4294901760, %v7153_v40 }
 0x1b7   : > { %5276 = vmatpush3.bf16.xpose.msra.mxu0 %v6425_v1  ;;  %5420 = vmatpush3.bf16.xpose.msra.mxu1 %v6431_v55  ;;  %v7172_v1 = vsub.f32 %v7153_v40, %v1573_v61  ;;  %v7177_v55 = vsub.f32 %v7157_v51, %v1576_v63  ;;  %v7352_v40 = vpack.c.bf16 %v1582_v62, %v1579_v25 }
 0x1b8   : > { %5277 = vmatprep.subr.bf16.mxu0 %v8351_v10  ;;  %5421 = vmatprep.subr.bf16.mxu1 %v8351_v10 }
 0x1b9   : > { %v1709_v56 = vand.u32 4294901760, %v7172_v1  ;;  %v1716_v38 = vand.u32 4294901760, %v7177_v55 }
 0x1bf   : > { %5279 = vmatpush3.bf16.xpose.msra.mxu0 %v6487_v15  ;;  %5423 = vmatpush3.bf16.xpose.msra.mxu1 %v6489_v7  ;;  %v7202_v7 = vsub.f32 %v7181_v35, %v1579_v25  ;;  %v7207_v15 = vsub.f32 %v7185_v14, %v1582_v62  ;;  %v5530_v14 = vpack.c.bf16 %v1646_v19, %v1639_v49 }
 0x1c0   : > { %5280 = vmatprep.subr.bf16.mxu0 %v8351_v10  ;;  %5424 = vmatprep.subr.bf16.mxu1 %v8351_v10  ;;  %v5533_v25 = vpack.c.bf16 %v1660_v52, %v1653_v34 }
 0x1c1   : > { %v1723_v39 = vand.u32 4294901760, %v7202_v7  ;;  %v1730_v50 = vand.u32 4294901760, %v7207_v15 }
 0x1c7   : > { %5282 = vmatpush3.bf16.xpose.msra.mxu0 %v8381_v0  ;;  %5426 = vmatpush3.bf16.xpose.msra.mxu1 %v8382_v36  ;;  %v1633_v0 = vsub.f32 %v7197_v2, %v8276_v24  ;;  %v1627_v36 = vand.u32 4294901760, %v1626_v3  ;;  %v1640_v24 = vsub.f32 %v7034_v12, %v1639_v49  ;;  %v5536_v12 = vpack.c.bf16 %v1674_v31, %v1667_v54 }
 0x1c8   : > { %5283 = vmatprep.subr.bf16.mxu0 %v8351_v10  ;;  %5427 = vmatprep.subr.bf16.mxu1 %v8351_v10 }
 0x1c9   : > { %v1634_v13 = vand.u32 4294901760, %v1633_v0  ;;  %v1654_v0 = vsub.f32 %v7066_v22, %v1653_v34  ;;  %v5542_v22 = vpack.c.bf16 %v1702_v5, %v1695_v53 }
 0x1cb   : > { %v5455_v42 = vpack.c.bf16 %v1634_v13, %v1627_v36  ;;  %v1661_v36 = vsub.f32 %v7071_v23, %v1660_v52  ;;  %v1655_v13 = vand.u32 4294901760, %v1654_v0  ;;  %v5545_v23 = vpack.c.bf16 %v1716_v38, %v1709_v56 }
 0x1cf   : > { %5285 = vmatpush3.bf16.xpose.msra.mxu0 %v8383_v46  ;;  %5429 = vmatpush3.bf16.xpose.msra.mxu1 %v8384_v16  ;;  %v1647_v46 = vsub.f32 %v7041_v59, %v1646_v19  ;;  %v1641_v16 = vand.u32 4294901760, %v1640_v24  ;;  %v5539_v59 = vpack.c.bf16 %v1688_v6, %v1681_v30 }
 0x1d0   : > { %5430 = vmatprep.subr.bf16.mxu0 %v8351_v10  ;;  %5454 = vmatprep.subr.bf16.mxu1 %v8351_v10 }
 0x1d1   : > { %v1648_v3 = vand.u32 4294901760, %v1647_v46  ;;  %v1662_v46 = vand.u32 4294901760, %v1661_v36  ;;  %v1682_v36 = vsub.f32 %v7118_v45, %v1681_v30 }
 0x1d3   : > { %v5458_v24 = vpack.c.bf16 %v1648_v3, %v1641_v16  ;;  %v1668_v16 = vsub.f32 %v7092_v57, %v1667_v54  ;;  %v1675_v3 = vsub.f32 %v7097_v32, %v1674_v31  ;;  %v5548_v57 = vpack.c.bf16 %v1730_v50, %v1723_v39  ;;  %v8435_v31 = vld [vmem:[#allocation13_spill] sm:$0xff] }
 0x1d5   : > { %v1676_v0 = vand.u32 4294901760, %v1675_v3  ;;  %v1703_v3 = vsub.f32 %v7149_v60, %v1702_v5  ;;  %v8437_v5 = vld [vmem:[#allocation15_spill] sm:$0xff] }
 0x1d6   : > { %4300 = vmatmul.mubr.f32.vlgmr.msra.gmra.mrb[0].mxu0 %v8277_v20  ;;  %4510 = vmatmul.mubr.f32.vlgmr.msra.gmra.mrb[0].mxu1 %v8277_v20 }
 0x1d7   : > { %5432 = vmatpush3.bf16.xpose.msra.mxu0 %v7229_v41  ;;  %5456 = vmatpush3.bf16.xpose.msra.mxu1 %v5455_v42  ;;  %v7252_v42 = vpack.c.bf16 %v1546_v33, %v1543_v21  ;;  %v7269_v21 = vpack.c.bf16 %v1552_v18, %v1549_v47  ;;  %v5461_v33 = vpack.c.bf16 %v1662_v46, %v1655_v13  ;;  %v1683_v46 = vand.u32 4294901760, %v1682_v36 }
 0x1d8   : > { %5433 = vmatprep.subr.bf16.mxu0 %v8351_v10  ;;  %5457 = vmatprep.subr.bf16.mxu1 %v8351_v10  ;;  %v7286_v47 = vpack.c.bf16 %v1558_v29, %v1555_v4  ;;  %v1689_v13 = vsub.f32 %v7123_v48, %v1688_v6  ;;  %v7303_v4 = vpack.c.bf16 %v1564_v26, %v1561_v58  ;;  %v2166_v48 = vlaneseq }
 0x1d9   : > { %4544 = vmatprep.mubr.msk.f32.mxu0 %vm6065_vm0, %v8364_v8  ;;  %4579 = vmatprep.mubr.msk.f32.mxu1 %vm6065_vm0, %v8364_v8  ;;  %v7320_v58 = vpack.c.bf16 %v1570_v37, %v1567_v27  ;;  %v1717_v36 = vsub.f32 %v7177_v55, %v1716_v38  ;;  %v7337_v27 = vpack.c.bf16 %v1576_v63, %v1573_v61  ;;  %v8430_v63 = vand.u32 4294901760, %v7197_v2 }
 0x1da   : > { %v5479_v61 = vpack.c.bf16 %v7197_v2, %v7195_v28  ;;  %v2167_v19 = vshrl.u32 %v2166_v48, 7  ;;  %v8432_v2 = vld [vmem:[#allocation8_spill] sm:$0xff] }
 0x1df   : > { %5435 = vmatpush3.bf16.xpose.msra.mxu0 %v7252_v42  ;;  %5459 = vmatpush3.bf16.xpose.msra.mxu1 %v5458_v24  ;;  %v1669_v24 = vand.u32 4294901760, %v1668_v16  ;;  %v1696_v16 = vsub.f32 %v7144_v11, %v1695_v53 }
 0x1e0   : > { %5436 = vmatprep.subr.bf16.mxu0 %v8351_v10  ;;  %5460 = vmatprep.subr.bf16.mxu1 %v8351_v10 }
 0x1e1   : > { %v5464_v18 = vpack.c.bf16 %v1676_v0, %v1669_v24  ;;  %v1697_v24 = vand.u32 4294901760, %v1696_v16  ;;  %v1704_v0 = vand.u32 4294901760, %v1703_v3 }
 0x1e3   : > { %v5470_v26 = vpack.c.bf16 %v1704_v0, %v1697_v24 }
 0x1e7   : > { %5438 = vmatpush3.bf16.xpose.msra.mxu0 %v7269_v21  ;;  %5462 = vmatpush3.bf16.xpose.msra.mxu1 %v5461_v33  ;;  %v1690_v33 = vand.u32 4294901760, %v1689_v13 }
 0x1e8   : > { %5439 = vmatprep.subr.bf16.mxu0 %v8351_v10  ;;  %5463 = vmatprep.subr.bf16.mxu1 %v8351_v10 }
 0x1e9   : > { %v5467_v29 = vpack.c.bf16 %v1690_v33, %v1683_v46  ;;  %v1718_v46 = vand.u32 4294901760, %v1717_v36  ;;  %v1724_v33 = vsub.f32 %v7202_v7, %v1723_v39 }
 0x1eb   : > { %v1725_v16 = vand.u32 4294901760, %v1724_v33 }
 0x1ef   : > { %5441 = vmatpush3.bf16.xpose.msra.mxu0 %v7286_v47  ;;  %5465 = vmatpush3.bf16.xpose.msra.mxu1 %v5464_v18  ;;  %v1710_v18 = vsub.f32 %v7172_v1, %v1709_v56  ;;  %v8438_v56 = vld [vmem:[#allocation16_spill] sm:$0xff] }
 0x1f0   : > { %5442 = vmatprep.subr.bf16.mxu0 %v8351_v10  ;;  %5466 = vmatprep.subr.bf16.mxu1 %v8351_v10 }
 0x1f1   : > { %v1711_v13 = vand.u32 4294901760, %v1710_v18 }
 0x1f3   : > { %v5473_v37 = vpack.c.bf16 %v1718_v46, %v1711_v13 }
 0x1f7   : > { %5444 = vmatpush3.bf16.xpose.msra.mxu0 %v7303_v4  ;;  %5468 = vmatpush3.bf16.xpose.msra.mxu1 %v5467_v29  ;;  %v1731_v29 = vsub.f32 %v7207_v15, %v1730_v50  ;;  %v8440_v50 = vld [vmem:[#allocation20_spill] sm:$0xff] }
 0x1f8   : > { %5445 = vmatprep.subr.bf16.mxu0 %v8351_v10  ;;  %5469 = vmatprep.subr.bf16.mxu1 %v8351_v10 }
 0x1f9   : > { %v1732_v3 = vand.u32 4294901760, %v1731_v29 }
 0x1fb   : > { %v5476_v51 = vpack.c.bf16 %v1732_v3, %v1725_v16  ;;  %v8442_v16 = vld [vmem:[#allocation22_spill] sm:$0xff] }
 0x1ff   : > { %5447 = vmatpush3.bf16.xpose.msra.mxu0 %v7320_v58  ;;  %5471 = vmatpush3.bf16.xpose.msra.mxu1 %v5470_v26 }
 0x200   : > { %5448 = vmatprep.subr.bf16.mxu0 %v8351_v10  ;;  %5472 = vmatprep.subr.bf16.mxu1 %v8351_v10 }
 0x207   : > { %5450 = vmatpush3.bf16.xpose.msra.mxu0 %v7337_v27  ;;  %5474 = vmatpush3.bf16.xpose.msra.mxu1 %v5473_v37  ;;  %v8441_v37 = vld [vmem:[#allocation21_spill] sm:$0xff] }
 0x208   : > { %5451 = vmatprep.subr.bf16.mxu0 %v8351_v10  ;;  %5475 = vmatprep.subr.bf16.mxu1 %v8351_v10 }
 0x20f   : > { %5453 = vmatpush3.bf16.xpose.msra.mxu0 %v7352_v40  ;;  %5477 = vmatpush3.bf16.xpose.msra.mxu1 %v5476_v51 }
 0x210   : > { %5478 = vmatprep.subr.bf16.mxu0 %v8351_v10  ;;  %5502 = vmatprep.subr.bf16.mxu1 %v8351_v10 }
 0x216   : > { %4545 = vmatmul.mubr.f32.vlgmr.msra.gmra.mrb[2].mxu0 %v8364_v8  ;;  %4580 = vmatmul.mubr.f32.vlgmr.msra.gmra.mrb[2].mxu1 %v8277_v20 }
 0x217   : > { %5480 = vmatpush3.bf16.xpose.msra.mxu0 %v5479_v61  ;;  %5504 = vmatpush3.bf16.xpose.msra.mxu1 %v7229_v41 }
 0x218   : > { %5481 = vmatprep.subr.bf16.mxu0 %v8351_v10  ;;  %5505 = vmatprep.subr.bf16.mxu1 %v8351_v10 }
 0x219   : > { %4614 = vmatprep.mubr.msk.f32.mxu0 %vm6065_vm0, %v8364_v8  ;;  %4649 = vmatprep.mubr.msk.f32.mxu1 %vm6065_vm0, %v8364_v8 }
 0x21f   : > { %5483 = vmatpush3.bf16.xpose.msra.mxu0 %v5482_v9  ;;  %5507 = vmatpush3.bf16.xpose.msra.mxu1 %v7252_v42  ;;  %v8426_v9 = vpack.c.bf16 %v7149_v60, %v7144_v11 }
 0x220   : > { %5484 = vmatprep.subr.bf16.mxu0 %v8351_v10  ;;  %5508 = vmatprep.subr.bf16.mxu1 %v8351_v10 }
 0x227   : > { %5486 = vmatpush3.bf16.xpose.msra.mxu0 %v5485_v44  ;;  %5510 = vmatpush3.bf16.xpose.msra.mxu1 %v7269_v21  ;;  %v8427_v44 = vpack.c.bf16 %v7177_v55, %v7172_v1  ;;  %v2168_v1 = vsub.s32 0, %v2167_v19 }
 0x228   : > { %5487 = vmatprep.subr.bf16.mxu0 %v8351_v10  ;;  %5511 = vmatprep.subr.bf16.mxu1 %v8351_v10 }
 0x22f   : > { %5489 = vmatpush3.bf16.xpose.msra.mxu0 %v5488_v43  ;;  %5513 = vmatpush3.bf16.xpose.msra.mxu1 %v7286_v47  ;;  %v8428_v43 = vpack.c.bf16 %v7207_v15, %v7202_v7  ;;  %v8433_v15 = vld [vmem:[#allocation12_spill] sm:$0xff] }
 0x230   : > { %5490 = vmatprep.subr.bf16.mxu0 %v8351_v10  ;;  %5514 = vmatprep.subr.bf16.mxu1 %v8351_v10 }
 0x237   : > { %5492 = vmatpush3.bf16.xpose.msra.mxu0 %v5491_v17  ;;  %5516 = vmatpush3.bf16.xpose.msra.mxu1 %v7303_v4  ;;  %v8429_v17 = vand.u32 4294901760, %v7195_v28 }
 0x238   : > { %5493 = vmatprep.subr.bf16.mxu0 %v8351_v10  ;;  %5517 = vmatprep.subr.bf16.mxu1 %v8351_v10 }
 0x239   : > { %v5527_v35 = vpack.c.bf16 %v8430_v63, %v8429_v17  ;;  %v8444_v63 = vld [vmem:[#allocation26_spill] sm:$0xff] }
 0x23f   : > { %5495 = vmatpush3.bf16.xpose.msra.mxu0 %v8426_v9  ;;  %5519 = vmatpush3.bf16.xpose.msra.mxu1 %v7320_v58 }
 0x240   : > { %5496 = vmatprep.subr.bf16.mxu0 %v8351_v10  ;;  %5520 = vmatprep.subr.bf16.mxu1 %v8351_v10 }
 0x247   : > { %5498 = vmatpush3.bf16.xpose.msra.mxu0 %v8427_v44  ;;  %5522 = vmatpush3.bf16.xpose.msra.mxu1 %v7337_v27 }
 0x248   : > { %5499 = vmatprep.subr.bf16.mxu0 %v8351_v10  ;;  %5523 = vmatprep.subr.bf16.mxu1 %v8351_v10 }
 0x24f   : > { %5501 = vmatpush3.bf16.xpose.msra.mxu0 %v8428_v43  ;;  %5525 = vmatpush3.bf16.xpose.msra.mxu1 %v7352_v40 }
 0x250   : > { %5526 = vmatprep.subr.bf16.mxu0 %v8351_v10  ;;  %5550 = vmatprep.subr.bf16.mxu1 %v8351_v10 }
 0x256   : > { %4615 = vmatmul.mubr.f32.vlgmr.msra.gmra.mrb[4].mxu0 %v8364_v8  ;;  %4650 = vmatmul.mubr.f32.vlgmr.msra.gmra.mrb[4].mxu1 %v8364_v8 }
 0x257   : > { %5528 = vmatpush3.bf16.xpose.msra.mxu0 %v5527_v35  ;;  %5552 = vmatpush3.bf16.xpose.msra.mxu1 %v7229_v41 }
 0x258   : > { %5529 = vmatprep.subr.bf16.mxu0 %v8351_v10  ;;  %5553 = vmatprep.subr.bf16.mxu1 %v8351_v10 }
 0x259   : > { %4684 = vmatprep.mubr.msk.f32.mxu0 %vm6065_vm0, %v8364_v8  ;;  %4719 = vmatprep.mubr.msk.f32.mxu1 %vm6065_vm0, %v8364_v8 }
 0x25f   : > { %5531 = vmatpush3.bf16.xpose.msra.mxu0 %v5530_v14  ;;  %5555 = vmatpush3.bf16.xpose.msra.mxu1 %v7252_v42  ;;  %v8434_v42 = vld [vmem:[#allocation9_spill] sm:$0xff]  ;;  %v8445_v14 = vld [vmem:[#allocation27_spill] sm:$0xff] }
 0x260   : > { %5532 = vmatprep.subr.bf16.mxu0 %v8351_v10  ;;  %5556 = vmatprep.subr.bf16.mxu1 %v8351_v10 }
 0x267   : > { %5534 = vmatpush3.bf16.xpose.msra.mxu0 %v5533_v25  ;;  %5558 = vmatpush3.bf16.xpose.msra.mxu1 %v7269_v21 }
 0x268   : > { %5535 = vmatprep.subr.bf16.mxu0 %v8351_v10  ;;  %5559 = vmatprep.subr.bf16.mxu1 %v8351_v10 }
 0x26f   : > { %5537 = vmatpush3.bf16.xpose.msra.mxu0 %v5536_v12  ;;  %5561 = vmatpush3.bf16.xpose.msra.mxu1 %v7286_v47  ;;  %v8436_v47 = vld [vmem:[#allocation14_spill] sm:$0xff] }
 0x270   : > { %5538 = vmatprep.subr.bf16.mxu0 %v8351_v10  ;;  %5562 = vmatprep.subr.bf16.mxu1 %v8351_v10 }
 0x277   : > { %5540 = vmatpush3.bf16.xpose.msra.mxu0 %v5539_v59  ;;  %5564 = vmatpush3.bf16.xpose.msra.mxu1 %v7303_v4  ;;  %v8446_v59 = vld [vmem:[#allocation28_spill] sm:$0xff] }
 0x278   : > { %5541 = vmatprep.subr.bf16.mxu0 %v8351_v10  ;;  %5565 = vmatprep.subr.bf16.mxu1 %v8351_v10 }
 0x27f   : > { %5543 = vmatpush3.bf16.xpose.msra.mxu0 %v5542_v22  ;;  %5567 = vmatpush3.bf16.xpose.msra.mxu1 %v7320_v58  ;;  %v8439_v58 = vld [vmem:[#allocation17_spill] sm:$0xff] }
 0x280   : > { %5544 = vmatprep.subr.bf16.mxu0 %v8351_v10  ;;  %5568 = vmatprep.subr.bf16.mxu1 %v8351_v10 }
 0x287   : > { %5546 = vmatpush3.bf16.xpose.msra.mxu0 %v5545_v23  ;;  %5570 = vmatpush3.bf16.xpose.msra.mxu1 %v7337_v27  ;;  %v8447_v23 = vld [vmem:[#allocation29_spill] sm:$0xff] }
 0x288   : > { %5547 = vmatprep.subr.bf16.mxu0 %v8351_v10  ;;  %5571 = vmatprep.subr.bf16.mxu1 %v8351_v10 }
 0x28f   : > { %5549 = vmatpush3.bf16.xpose.msra.mxu0 %v5548_v57  ;;  %5573 = vmatpush3.bf16.xpose.msra.mxu1 %v7352_v40  ;;  %v8443_v40 = vld [vmem:[#allocation23_spill] sm:$0xff] }
 0x290   : > { %5718 = vmatprep.subr.bf16.mxu1 %v8351_v10  ;;  %5574 = vmatprep.subr.bf16.mxu0 %v8351_v10 }
 0x296   : > { %4685 = vmatmul.mubr.f32.vlgmr.msra.gmra.mrb[6].mxu0 %v8277_v20  ;;  %4720 = vmatmul.mubr.f32.vlgmr.msra.gmra.mrb[6].mxu1 %v8277_v20 }
 0x297   : > { %4964 = vmatprep.mubr.msk.f32.mxu1 %vm6065_vm0, %v8364_v8  ;;  %4754 = vmatprep.mubr.msk.f32.mxu0 %vm6065_vm0, %v8364_v8 }
 0x2a9   : > { %v7478_v32 = vpop.f32.mrb[0].mxu0  ;;  %v1516_v45 = vpop.f32.mrb[0].mxu1 }
 0x2aa   : > { %8431 = vst [vmem:[#allocation54_spill] sm:$0xff] %v7478_v32  ;;  %5952 = vrcp.f32 %v1516_v45  ;;  %v4301_v11 = vpop.f32.mrb[1].mxu0  ;;  %v4511_v60 = vpop.f32.mrb[1].mxu1 }
 0x2b4   : > { %v5953_v55 = vpop.eup %5952 }
 0x2b5   : > { %v2165_v49 = vmul.f32 %v5953_v55, %v5953_v55  ;;  %v7480_v62 = vrot.slane %v5953_v55, %v2168_v1 }
 0x2b7   : > { %v7482_v28 = vrot.slane %v2165_v49, %v2168_v1  ;;  %v2818_v7 = vmul.f32 %v7480_v62, %v8432_v2  ;;  %v2819_v41 = vmul.f32 %v7480_v62, %v8433_v15  ;;  %v2820_v53 = vmul.f32 %v7480_v62, %v8436_v47  ;;  %v8448_v1 = vld [vmem:[#allocation32_spill] sm:$0xff]  ;;  %v8449_v49 = vld [vmem:[#allocation33_spill] sm:$0xff] }
 0x2b8   : > { %v2821_v4 = vmul.f32 %v7480_v62, %v8437_v5  ;;  %v2822_v27 = vmul.f32 %v7480_v62, %v8440_v50  ;;  %v2823_v33 = vmul.f32 %v7480_v62, %v8441_v37  ;;  %v2824_v35 = vmul.f32 %v7480_v62, %v8444_v63 }
 0x2b9   : > { %v2835_v34 = vand.u32 4294901760, %v2818_v7  ;;  %v2838_v52 = vand.u32 4294901760, %v2819_v41  ;;  %v2170_v54 = vmul.f32 %v7482_v28, %v8434_v42  ;;  %v2171_v21 = vmul.f32 %v7482_v28, %v8435_v31 }
 0x2ba   : > { %v2172_v38 = vmul.f32 %v7482_v28, %v8438_v56  ;;  %v2173_v26 = vmul.f32 %v7482_v28, %v8439_v58  ;;  %v2841_v18 = vand.u32 4294901760, %v2820_v53  ;;  %v2844_v36 = vand.u32 4294901760, %v2821_v4 }
 0x2bb   : > { %v7492_v30 = vpack.c.bf16 %v2838_v52, %v2835_v34  ;;  %v2187_v6 = vand.u32 4294901760, %v2170_v54  ;;  %v2190_v24 = vand.u32 4294901760, %v2171_v21  ;;  %v2174_v3 = vmul.f32 %v7482_v28, %v8442_v16 }
 0x2bc   : > { %v2193_v13 = vand.u32 4294901760, %v2172_v38  ;;  %v2196_v46 = vand.u32 4294901760, %v2173_v26  ;;  %v7508_v39 = vpack.c.bf16 %v2844_v36, %v2841_v18  ;;  %v2175_v51 = vmul.f32 %v7482_v28, %v8443_v40 }
 0x2bd   : > { %5720 = vmatpush3.bf16.xpose.msra.mxu1 %v7492_v30  ;;  %v7499_v0 = vpack.c.bf16 %v2190_v24, %v2187_v6  ;;  %v2847_v61 = vand.u32 4294901760, %v2822_v27  ;;  %v2850_v9 = vand.u32 4294901760, %v2823_v33  ;;  %v2199_v44 = vand.u32 4294901760, %v2174_v3 }
 0x2be   : > { %5721 = vmatprep.subr.bf16.mxu1 %v8351_v10  ;;  %v7515_v29 = vpack.c.bf16 %v2196_v46, %v2193_v13  ;;  %v2202_v43 = vand.u32 4294901760, %v2175_v51  ;;  %v2825_v25 = vmul.f32 %v7480_v62, %v8445_v14  ;;  %v2176_v22 = vmul.f32 %v7482_v28, %v8446_v59 }
 0x2bf   : > { %5576 = vmatpush3.bf16.xpose.msra.mxu0 %v7499_v0  ;;  %v7524_v17 = vpack.c.bf16 %v2850_v9, %v2847_v61  ;;  %v2177_v57 = vmul.f32 %v7482_v28, %v8447_v23  ;;  %v2853_v45 = vand.u32 4294901760, %v2824_v35  ;;  %v2826_v55 = vmul.f32 %v7480_v62, %v8448_v1 }
 0x2c0   : > { %5577 = vmatprep.subr.bf16.mxu0 %v8351_v10  ;;  %v7531_v12 = vpack.c.bf16 %v2202_v43, %v2199_v44  ;;  %v2856_v48 = vand.u32 4294901760, %v2825_v25  ;;  %v2205_v11 = vand.u32 4294901760, %v2176_v22  ;;  %v2827_v2 = vmul.f32 %v7480_v62, %v8449_v49  ;;  %v8458_v49 = vld [vmem:[#allocation47_spill] sm:$0xff] }
 0x2c1   : > { %v2208_v60 = vand.u32 4294901760, %v2177_v57  ;;  %v7546_v15 = vsub.f32 %v2818_v7, %v2835_v34  ;;  %v7548_v42 = vsub.f32 %v2819_v41, %v2838_v52  ;;  %v7550_v31 = vsub.f32 %v2170_v54, %v2187_v6  ;;  %v8450_v7 = vld [vmem:[#allocation34_spill] sm:$0xff]  ;;  %v8451_v34 = vld [vmem:[#allocation35_spill] sm:$0xff] }
 0x2c2   : > { %v7540_v19 = vpack.c.bf16 %v2856_v48, %v2853_v45  ;;  %v7552_v47 = vsub.f32 %v2171_v21, %v2190_v24  ;;  %v7554_v5 = vsub.f32 %v2820_v53, %v2841_v18  ;;  %v7556_v56 = vsub.f32 %v2821_v4, %v2844_v36  ;;  %v8453_v36 = vld [vmem:[#allocation39_spill] sm:$0xff] }
 0x2c3   : > { %v7559_v58 = vsub.f32 %v2172_v38, %v2193_v13  ;;  %v7561_v50 = vpack.c.bf16 %v2208_v60, %v2205_v11  ;;  %v2178_v41 = vmul.f32 %v7482_v28, %v8450_v7  ;;  %v2179_v52 = vmul.f32 %v7482_v28, %v8451_v34  ;;  %v8452_v38 = vld [vmem:[#allocation38_spill] sm:$0xff]  ;;  %v8462_v34 = vld [vmem:[#allocation51_spill] sm:$0xff] }
 0x2c4   : > { %v7568_v54 = vsub.f32 %v2173_v26, %v2196_v46  ;;  %v7570_v21 = vsub.f32 %v2822_v27, %v2847_v61  ;;  %v2859_v6 = vand.u32 4294901760, %v2826_v55  ;;  %v2862_v53 = vand.u32 4294901760, %v2827_v2  ;;  %v8454_v46 = vld [vmem:[#allocation40_spill] sm:$0xff]  ;;  %v8461_v7 = vld [vmem:[#allocation50_spill] sm:$0xff] }
 0x2c5   : > { %5723 = vmatpush3.bf16.xpose.msra.mxu1 %v7508_v39  ;;  %v7572_v4 = vsub.f32 %v2823_v33, %v2850_v9  ;;  %v7574_v24 = vsub.f32 %v2174_v3, %v2199_v44  ;;  %v2828_v18 = vmul.f32 %v7480_v62, %v8452_v38  ;;  %v2829_v13 = vmul.f32 %v7480_v62, %v8453_v36  ;;  %v8455_v33 = vld [vmem:[#allocation41_spill] sm:$0xff]  ;;  %v8456_v9 = vld [vmem:[#allocation44_spill] sm:$0xff] }
 0x2c6   : > { %5724 = vmatprep.subr.bf16.mxu1 %v8351_v10  ;;  %v7581_v37 = vsub.f32 %v2175_v51, %v2202_v43  ;;  %v7583_v26 = vsub.f32 %v2824_v35, %v2853_v45  ;;  %v2180_v27 = vmul.f32 %v7482_v28, %v8454_v46  ;;  %v2181_v16 = vmul.f32 %v7482_v28, %v8455_v33  ;;  %v8457_v35 = vld [vmem:[#allocation45_spill] sm:$0xff]  ;;  %v8463_v36 = vld [vmem:[#allocation52_spill] sm:$0xff] }
 0x2c7   : > { %5579 = vmatpush3.bf16.xpose.msra.mxu0 %v7515_v29  ;;  %v7590_v3 = vsub.f32 %v2825_v25, %v2856_v48  ;;  %v2211_v40 = vand.u32 4294901760, %v2178_v41  ;;  %v2214_v61 = vand.u32 4294901760, %v2179_v52  ;;  %v2830_v44 = vmul.f32 %v7480_v62, %v8456_v9  ;;  %v8464_v33 = vld [vmem:[#allocation53_spill] sm:$0xff] }
 0x2c8   : > { %5580 = vmatprep.subr.bf16.mxu0 %v8351_v10  ;;  %v7594_v63 = vsub.f32 %v2176_v22, %v2205_v11  ;;  %v7596_v51 = vsub.f32 %v2177_v57, %v2208_v60  ;;  %v7598_v43 = vpack.c.bf16 %v2862_v53, %v2859_v6  ;;  %v2831_v14 = vmul.f32 %v7480_v62, %v8457_v35  ;;  %v8459_v57 = vld [vmem:[#allocation48_spill] sm:$0xff] }
 0x2c9   : > { %v7602_v59 = vsub.f32 %v2826_v55, %v2859_v6  ;;  %v7604_v23 = vsub.f32 %v2827_v2, %v2862_v53  ;;  %v2865_v25 = vand.u32 4294901760, %v2828_v18  ;;  %v2868_v45 = vand.u32 4294901760, %v2829_v13 }
 0x2ca   : > { %v2217_v48 = vand.u32 4294901760, %v2180_v27  ;;  %v2220_v1 = vand.u32 4294901760, %v2181_v16  ;;  %v2182_v22 = vmul.f32 %v7482_v28, %v8458_v49  ;;  %v2183_v11 = vmul.f32 %v7482_v28, %v8459_v57 }
 0x2cb   : > { %v7611_v60 = vpack.c.bf16 %v2214_v61, %v2211_v40  ;;  %v2871_v55 = vand.u32 4294901760, %v2830_v44  ;;  %v2832_v2 = vmul.f32 %v7480_v62, %v8461_v7  ;;  %v2833_v6 = vmul.f32 %v7480_v62, %v8462_v34 }
 0x2cc   : > { %v7618_v53 = vsub.f32 %v2178_v41, %v2211_v40  ;;  %v2874_v38 = vand.u32 4294901760, %v2831_v14  ;;  %v2184_v46 = vmul.f32 %v7482_v28, %v8463_v36  ;;  %v2185_v9 = vmul.f32 %v7482_v28, %v8464_v33 }
 0x2cd   : > { %5726 = vmatpush3.bf16.xpose.msra.mxu1 %v7524_v17  ;;  %8460 = vst [vmem:[#allocation55_spill] sm:$0xff] %v7611_v60  ;;  %v7625_v35 = vsub.f32 %v2179_v52, %v2214_v61  ;;  %v7627_v49 = vpack.c.bf16 %v2868_v45, %v2865_v25  ;;  %v7629_v57 = vsub.f32 %v2828_v18, %v2865_v25  ;;  %v8279_v7 = vand.u32 4294901760, %v7546_v15 }
 0x2ce   : > { %5727 = vmatprep.subr.bf16.mxu1 %v8351_v10  ;;  %v7632_v62 = vsub.f32 %v2829_v13, %v2868_v45  ;;  %v2223_v41 = vand.u32 4294901760, %v2182_v22  ;;  %v2226_v40 = vand.u32 4294901760, %v2183_v11  ;;  %v7636_v36 = vpack.c.bf16 %v2220_v1, %v2217_v48 }
 0x2cf   : > { %5582 = vmatpush3.bf16.xpose.msra.mxu0 %v7531_v12  ;;  %8465 = vst [vmem:[#allocation56_spill] sm:$0xff] %v7627_v49  ;;  %v7638_v28 = vsub.f32 %v2180_v27, %v2217_v48  ;;  %v2877_v52 = vand.u32 4294901760, %v2832_v2  ;;  %v2880_v61 = vand.u32 4294901760, %v2833_v6  ;;  %v7640_v33 = vsub.f32 %v2181_v16, %v2220_v1 }
 0x2d0   : > { %5583 = vmatprep.subr.bf16.mxu0 %v8351_v10  ;;  %8466 = vst [vmem:[#allocation57_spill] sm:$0xff] %v7636_v36  ;;  %v7642_v18 = vpack.c.bf16 %v2874_v38, %v2871_v55  ;;  %v2229_v25 = vand.u32 4294901760, %v2184_v46  ;;  %v2232_v20 = vand.u32 4294901760, %v2185_v9  ;;  %v7644_v13 = vsub.f32 %v2830_v44, %v2871_v55 }
 0x2d1   : > { %v7646_v45 = vsub.f32 %v2831_v14, %v2874_v38  ;;  %v7651_v34 = vsub.f32 %v7546_v15, %v8279_v7  ;;  %v7655_v48 = vpack.c.bf16 %v2226_v40, %v2223_v41  ;;  %v7657_v16 = vsub.f32 %v2182_v22, %v2223_v41 }
 0x2d2   : > { %v8467_v1 = vand.u32 4294901760, %v7548_v42  ;;  %v7666_v55 = vsub.f32 %v2183_v11, %v2226_v40  ;;  %v7668_v38 = vpack.c.bf16 %v2880_v61, %v2877_v52  ;;  %v7670_v7 = vsub.f32 %v2832_v2, %v2877_v52 }
 0x2d3   : > { %v7672_v27 = vsub.f32 %v2833_v6, %v2880_v61  ;;  %v7674_v32 = vpack.c.bf16 %v2232_v20, %v2229_v25  ;;  %v7676_v22 = vsub.f32 %v2184_v46, %v2229_v25  ;;  %v7678_v41 = vsub.f32 %v2185_v9, %v2232_v20 }
 0x2d4   : > { %v7662_v44 = vsub.f32 %v7548_v42, %v8467_v1  ;;  %8468 = vst [vmem:[#allocation10_spill] sm:$0xff] %v7668_v38  ;;  %v8470_v14 = vand.u32 4294901760, %v7550_v31  ;;  %v8471_v20 = vand.u32 4294901760, %v7552_v47  ;;  %v8478_v9 = vand.u32 4294901760, %v7554_v5 }
 0x2d5   : > { %5729 = vmatpush3.bf16.xpose.msra.mxu1 %v7540_v19  ;;  %8469 = vst [vmem:[#allocation11_spill] sm:$0xff] %v7674_v32 }
 0x2d6   : > { %5730 = vmatprep.subr.bf16.mxu1 %v8351_v10  ;;  %v7685_v11 = vsub.f32 %v7550_v31, %v8470_v14  ;;  %v7694_v46 = vsub.f32 %v7552_v47, %v8471_v20  ;;  %v8476_v61 = vmov %v8471_v20  ;;  %v8479_v20 = vand.u32 4294901760, %v7556_v56 }
 0x2d7   : > { %5585 = vmatpush3.bf16.xpose.msra.mxu0 %v7561_v50 }
 0x2d8   : > { %5586 = vmatprep.subr.bf16.mxu0 %v8351_v10  ;;  %v7774_v52 = vpack.c.bf16 %v8479_v20, %v8478_v9  ;;  %v8490_v9 = vand.u32 4294901760, %v7583_v26  ;;  %v8491_v20 = vand.u32 4294901760, %v7590_v3 }
 0x2da   : > { %8480 = vst [vmem:[#allocation24_spill] sm:$0xff] %v7774_v52 }
 0x2dd   : > { %5732 = vmatpush3.bf16.xpose.msra.mxu1 %v7598_v43 }
 0x2de   : > { %5733 = vmatprep.subr.bf16.mxu1 %v8351_v10 }
 0x2df   : > { %5588 = vmatpush3.bf16.xpose.msra.mxu0 %v7611_v60  ;;  %v8473_v60 = vand.u32 4294901760, %v7548_v42 }
 0x2e0   : > { %5589 = vmatprep.subr.bf16.mxu0 %v8351_v10 }
 0x2e5   : > { %5735 = vmatpush3.bf16.xpose.msra.mxu1 %v7627_v49  ;;  %v8482_v49 = vand.u32 4294901760, %v7568_v54 }
 0x2e6   : > { %5736 = vmatprep.subr.bf16.mxu1 %v8351_v10 }
 0x2e7   : > { %5591 = vmatpush3.bf16.xpose.msra.mxu0 %v7636_v36 }
 0x2e8   : > { %5592 = vmatprep.subr.bf16.mxu0 %v8351_v10 }
 0x2e9   : > { %v1618_v25 = vpop.f32.mrb[2].mxu0  ;;  %v1768_v14 = vpop.f32.mrb[2].mxu1 }
 0x2ea   : > { %v7700_v6 = vadd.f32 %v1768_v14, %v1618_v25  ;;  %v4546_v40 = vpop.f32.mrb[3].mxu0  ;;  %v4581_v1 = vpop.f32.mrb[3].mxu1  ;;  %v8481_v14 = vand.u32 4294901760, %v7559_v58 }
 0x2eb   : > { %v8472_v40 = vand.u32 4294901760, %v7546_v15  ;;  %v8475_v1 = vand.u32 4294901760, %v7550_v31 }
 0x2ec   : > { %v7780_v36 = vpack.c.bf16 %v8482_v49, %v8481_v14  ;;  %v7799_v49 = vpack.c.bf16 %v8491_v20, %v8490_v9  ;;  %v8493_v14 = vand.u32 4294901760, %v7594_v63  ;;  %v8502_v9 = vand.u32 4294901760, %v7629_v57 }
 0x2ed   : > { %5738 = vmatpush3.bf16.xpose.msra.mxu1 %v7642_v18  ;;  %v7762_v25 = vpack.c.bf16 %v8473_v60, %v8472_v40  ;;  %v7768_v2 = vpack.c.bf16 %v8476_v61, %v8475_v1  ;;  %v8484_v60 = vand.u32 4294901760, %v7570_v21  ;;  %v8485_v40 = vand.u32 4294901760, %v7572_v4 }
 0x2ee   : > { %5739 = vmatprep.subr.bf16.mxu1 %v8351_v10  ;;  %8483 = vst [vmem:[#allocation25_spill] sm:$0xff] %v7780_v36  ;;  %v8487_v61 = vand.u32 4294901760, %v7574_v24  ;;  %v8488_v1 = vand.u32 4294901760, %v7581_v37  ;;  %8492 = vst [vmem:[#allocation36_spill] sm:$0xff] %v7799_v49  ;;  %v8494_v36 = vand.u32 4294901760, %v7596_v51  ;;  %v8503_v20 = vand.u32 4294901760, %v7632_v62 }
 0x2ef   : > { %5594 = vmatpush3.bf16.xpose.msra.mxu0 %v7655_v48  ;;  %8474 = vst [vmem:[#allocation18_spill] sm:$0xff] %v7762_v25  ;;  %8477 = vst [vmem:[#allocation19_spill] sm:$0xff] %v7768_v2  ;;  %v7786_v25 = vpack.c.bf16 %v8485_v40, %v8484_v60  ;;  %v8496_v40 = vand.u32 4294901760, %v7602_v59 }
 0x2f0   : > { %5595 = vmatprep.subr.bf16.mxu0 %v8351_v10  ;;  %v7792_v2 = vpack.c.bf16 %v8488_v1, %v8487_v61  ;;  %v7805_v60 = vpack.c.bf16 %v8494_v36, %v8493_v14  ;;  %v8499_v1 = vand.u32 4294901760, %v7618_v53  ;;  %v7824_v36 = vpack.c.bf16 %v8503_v20, %v8502_v9 }
 0x2f1   : > { %8486 = vst [vmem:[#allocation30_spill] sm:$0xff] %v7786_v25  ;;  %v8497_v25 = vand.u32 4294901760, %v7604_v23  ;;  %v8505_v14 = vand.u32 4294901760, %v7638_v28  ;;  %v2925_v9 = vand.u32 4294901760, %v7651_v34  ;;  %v2932_v20 = vand.u32 4294901760, %v7662_v44 }
 0x2f2   : > { %8489 = vst [vmem:[#allocation31_spill] sm:$0xff] %v7792_v2  ;;  %8495 = vst [vmem:[#allocation37_spill] sm:$0xff] %v7805_v60  ;;  %v8500_v2 = vand.u32 4294901760, %v7625_v35  ;;  %v8506_v60 = vand.u32 4294901760, %v7640_v33  ;;  %v2277_v34 = vand.u32 4294901760, %v7685_v11  ;;  %v2284_v44 = vand.u32 4294901760, %v7694_v46 }
 0x2f3   : > { %v7811_v61 = vpack.c.bf16 %v8497_v25, %v8496_v40  ;;  %8504 = vst [vmem:[#allocation46_spill] sm:$0xff] %v7824_v36  ;;  %v8508_v40 = vand.u32 4294901760, %v7644_v13  ;;  %v8514_v36 = vand.u32 4294901760, %v7670_v7  ;;  %v8522_v11 = vand.u32 4294901760, %v7559_v58 }
 0x2f4   : > { %v7817_v52 = vpack.c.bf16 %v8500_v2, %v8499_v1  ;;  %v7830_v25 = vpack.c.bf16 %v8506_v60, %v8505_v14  ;;  %v8511_v1 = vand.u32 4294901760, %v7657_v16  ;;  %v8515_v60 = vand.u32 4294901760, %v7672_v27 }
 0x2f5   : > { %5741 = vmatpush3.bf16.xpose.msra.mxu1 %v7668_v38  ;;  %8498 = vst [vmem:[#allocation42_spill] sm:$0xff] %v7811_v61  ;;  %v8509_v61 = vand.u32 4294901760, %v7646_v45  ;;  %v2290_v46 = vsub.f32 %v7559_v58, %v8522_v11 }
 0x2f6   : > { %8501 = vst [vmem:[#allocation43_spill] sm:$0xff] %v7817_v52  ;;  %5742 = vmatprep.subr.bf16.mxu1 %v8351_v10  ;;  %8507 = vst [vmem:[#allocation49_spill] sm:$0xff] %v7830_v25  ;;  %v8512_v52 = vand.u32 4294901760, %v7666_v55  ;;  %v7850_v14 = vpack.c.bf16 %v8515_v60, %v8514_v36  ;;  %v8517_v25 = vand.u32 4294901760, %v7676_v22  ;;  %v8521_v60 = vand.u32 4294901760, %v7556_v56 }
 0x2f7   : > { %v7836_v2 = vpack.c.bf16 %v8509_v61, %v8508_v40  ;;  %v8518_v61 = vand.u32 4294901760, %v7678_v41  ;;  %5597 = vmatpush3.bf16.xpose.msra.mxu0 %v7674_v32 }
 0x2f8   : > { %v7842_v49 = vpack.c.bf16 %v8512_v52, %v8511_v1  ;;  %8516 = vst [vmem:[#allocation9_spill] sm:$0xff] %v7850_v14  ;;  %5598 = vmatprep.subr.bf16.mxu0 %v8351_v10  ;;  %v5743_v52 = vpack.c.bf16 %v2932_v20, %v2925_v9  ;;  %v8520_v1 = vand.u32 4294901760, %v7554_v5  ;;  %v2945_v14 = vsub.f32 %v7556_v56, %v8521_v60 }
 0x2f9   : > { %8510 = vst [vmem:[#allocation8_spill] sm:$0xff] %v7836_v2  ;;  %v7856_v40 = vpack.c.bf16 %v8518_v61, %v8517_v25  ;;  %v5599_v25 = vpack.c.bf16 %v2284_v44, %v2277_v34  ;;  %v8523_v9 = vand.u32 4294901760, %v7568_v54  ;;  %v2291_v34 = vand.u32 4294901760, %v2290_v46 }
 0x2fa   : > { %8513 = vst [vmem:[#allocation12_spill] sm:$0xff] %v7842_v49  ;;  %v2938_v36 = vsub.f32 %v7554_v5, %v8520_v1  ;;  %v2946_v1 = vand.u32 4294901760, %v2945_v14  ;;  %v8524_v60 = vand.u32 4294901760, %v7570_v21  ;;  %v8526_v14 = vand.u32 4294901760, %v7574_v24 }
 0x2fb   : > { %8519 = vst [vmem:[#allocation13_spill] sm:$0xff] %v7856_v40  ;;  %v2297_v20 = vsub.f32 %v7568_v54, %v8523_v9  ;;  %v8525_v40 = vand.u32 4294901760, %v7572_v4  ;;  %v8527_v46 = vand.u32 4294901760, %v7581_v37 }
 0x2fc   : > { %4965 = vmatmul.mubr.f32.vlgmr.msra.gmra.mrb[8].mxu1 %v8364_v8  ;;  %v2939_v61 = vand.u32 4294901760, %v2938_v36  ;;  %v2952_v11 = vsub.f32 %v7570_v21, %v8524_v60 }
 0x2fd   : > { %5744 = vmatpush3.bf16.xpose.msra.mxu1 %v5743_v52  ;;  %4999 = vmatprep.mubr.msk.f32.mxu1 %vm6065_vm0, %v8364_v8  ;;  %v2298_v44 = vand.u32 4294901760, %v2297_v20  ;;  %v2959_v9 = vsub.f32 %v7572_v4, %v8525_v40  ;;  %v2311_v20 = vsub.f32 %v7581_v37, %v8527_v46 }
 0x2fe   : > { %5745 = vmatprep.subr.bf16.mxu1 %v8351_v10  ;;  %4755 = vmatmul.mubr.f32.vlgmr.msra.gmra.mrb[8].mxu0 %v8364_v8  ;;  %v5746_v52 = vpack.c.bf16 %v2946_v1, %v2939_v61  ;;  %v2953_v61 = vand.u32 4294901760, %v2952_v11  ;;  %v8530_v11 = vand.u32 4294901760, %v7594_v63 }
 0x2ff   : > { %5600 = vmatpush3.bf16.xpose.msra.mxu0 %v5599_v25  ;;  %4789 = vmatprep.mubr.msk.f32.mxu0 %vm6065_vm0, %v8364_v8  ;;  %v5602_v36 = vpack.c.bf16 %v2298_v44, %v2291_v34  ;;  %v2304_v25 = vsub.f32 %v7574_v24, %v8526_v14  ;;  %v2960_v1 = vand.u32 4294901760, %v2959_v9  ;;  %v2312_v49 = vand.u32 4294901760, %v2311_v20 }
 0x300   : > { %5601 = vmatprep.subr.bf16.mxu0 %v8351_v10  ;;  %v8528_v34 = vand.u32 4294901760, %v7583_v26  ;;  %v2318_v9 = vsub.f32 %v7594_v63, %v8530_v11 }
 0x301   : > { %v2305_v60 = vand.u32 4294901760, %v2304_v25  ;;  %v5749_v40 = vpack.c.bf16 %v2960_v1, %v2953_v61 }
 0x302   : > { %v2966_v44 = vsub.f32 %v7583_v26, %v8528_v34  ;;  %v2319_v61 = vand.u32 4294901760, %v2318_v9 }
 0x303   : > { %v5605_v2 = vpack.c.bf16 %v2312_v49, %v2305_v60  ;;  %v8532_v49 = vand.u32 4294901760, %v7602_v59 }
 0x304   : > { %v2967_v46 = vand.u32 4294901760, %v2966_v44  ;;  %v8534_v44 = vand.u32 4294901760, %v7618_v53 }
 0x305   : > { %5747 = vmatpush3.bf16.xpose.msra.mxu1 %v5746_v52  ;;  %v8529_v52 = vand.u32 4294901760, %v7590_v3  ;;  %v2980_v60 = vsub.f32 %v7602_v59, %v8532_v49 }
 0x306   : > { %5748 = vmatprep.subr.bf16.mxu1 %v8351_v10 }
 0x307   : > { %5603 = vmatpush3.bf16.xpose.msra.mxu0 %v5602_v36  ;;  %v2973_v14 = vsub.f32 %v7590_v3, %v8529_v52  ;;  %v8531_v36 = vand.u32 4294901760, %v7596_v51 }
 0x308   : > { %5604 = vmatprep.subr.bf16.mxu0 %v8351_v10 }
 0x309   : > { %v2325_v25 = vsub.f32 %v7596_v51, %v8531_v36  ;;  %v2974_v20 = vand.u32 4294901760, %v2973_v14  ;;  %v8535_v14 = vand.u32 4294901760, %v7625_v35  ;;  %v2981_v36 = vand.u32 4294901760, %v2980_v60 }
 0x30a   : > { %v8538_v60 = vand.u32 4294901760, %v7638_v28 }
 0x30b   : > { %v2326_v1 = vand.u32 4294901760, %v2325_v25  ;;  %v5752_v34 = vpack.c.bf16 %v2974_v20, %v2967_v46  ;;  %v2339_v9 = vsub.f32 %v7625_v35, %v8535_v14 }
 0x30d   : > { %5750 = vmatpush3.bf16.xpose.msra.mxu1 %v5749_v40  ;;  %v8533_v40 = vand.u32 4294901760, %v7604_v23  ;;  %v5608_v11 = vpack.c.bf16 %v2326_v1, %v2319_v61  ;;  %v2340_v20 = vand.u32 4294901760, %v2339_v9  ;;  %v8536_v61 = vand.u32 4294901760, %v7629_v57 }
 0x30e   : > { %5751 = vmatprep.subr.bf16.mxu1 %v8351_v10 }
 0x30f   : > { %5606 = vmatpush3.bf16.xpose.msra.mxu0 %v5605_v2  ;;  %v2987_v52 = vsub.f32 %v7604_v23, %v8533_v40  ;;  %v2332_v2 = vsub.f32 %v7618_v53, %v8534_v44  ;;  %v2994_v1 = vsub.f32 %v7629_v57, %v8536_v61 }
 0x310   : > { %5607 = vmatprep.subr.bf16.mxu0 %v8351_v10 }
 0x311   : > { %v2988_v25 = vand.u32 4294901760, %v2987_v52  ;;  %v2333_v46 = vand.u32 4294901760, %v2332_v2  ;;  %v2346_v52 = vsub.f32 %v7638_v28, %v8538_v60  ;;  %v2995_v14 = vand.u32 4294901760, %v2994_v1 }
 0x312   : > { %v8542_v1 = vand.u32 4294901760, %v7657_v16 }
 0x313   : > { %v5755_v49 = vpack.c.bf16 %v2988_v25, %v2981_v36  ;;  %v5611_v44 = vpack.c.bf16 %v2340_v20, %v2333_v46  ;;  %v2347_v36 = vand.u32 4294901760, %v2346_v52  ;;  %v8540_v46 = vand.u32 4294901760, %v7644_v13 }
 0x315   : > { %5753 = vmatpush3.bf16.xpose.msra.mxu1 %v5752_v34  ;;  %v8537_v34 = vand.u32 4294901760, %v7632_v62  ;;  %v3008_v20 = vsub.f32 %v7644_v13, %v8540_v46 }
 0x316   : > { %5754 = vmatprep.subr.bf16.mxu1 %v8351_v10 }
 0x317   : > { %5609 = vmatpush3.bf16.xpose.msra.mxu0 %v5608_v11  ;;  %v3001_v40 = vsub.f32 %v7632_v62, %v8537_v34  ;;  %v8539_v11 = vand.u32 4294901760, %v7640_v33 }
 0x318   : > { %5610 = vmatprep.subr.bf16.mxu0 %v8351_v10 }
 0x319   : > { %v2353_v2 = vsub.f32 %v7640_v33, %v8539_v11  ;;  %v3002_v9 = vand.u32 4294901760, %v3001_v40  ;;  %v2360_v40 = vsub.f32 %v7657_v16, %v8542_v1  ;;  %v3009_v11 = vand.u32 4294901760, %v3008_v20 }
 0x31a   : > { %v8544_v1 = vand.u32 4294901760, %v7670_v7 }
 0x31b   : > { %v2354_v25 = vand.u32 4294901760, %v2353_v2  ;;  %v5758_v61 = vpack.c.bf16 %v3002_v9, %v2995_v14 }
 0x31c   : > { %v3022_v38 = vsub.f32 %v7670_v7, %v8544_v1  ;;  %v8578_v1 = vld [vmem:[#allocation42_spill] sm:$0xff] }
 0x31d   : > { %5756 = vmatpush3.bf16.xpose.msra.mxu1 %v5755_v49  ;;  %v8541_v49 = vand.u32 4294901760, %v7646_v45  ;;  %v5614_v60 = vpack.c.bf16 %v2354_v25, %v2347_v36  ;;  %v2361_v36 = vand.u32 4294901760, %v2360_v40 }
 0x31e   : > { %5757 = vmatprep.subr.bf16.mxu1 %v8351_v10 }
 0x31f   : > { %5612 = vmatpush3.bf16.xpose.msra.mxu0 %v5611_v44  ;;  %v3015_v34 = vsub.f32 %v7646_v45, %v8541_v49  ;;  %v8543_v44 = vand.u32 4294901760, %v7666_v55 }
 0x320   : > { %5613 = vmatprep.subr.bf16.mxu0 %v8351_v10 }
 0x321   : > { %v2367_v52 = vsub.f32 %v7666_v55, %v8543_v44  ;;  %v3016_v2 = vand.u32 4294901760, %v3015_v34  ;;  %v8545_v44 = vand.u32 4294901760, %v7672_v27 }
 0x323   : > { %v2368_v25 = vand.u32 4294901760, %v2367_v52  ;;  %v5761_v32 = vpack.c.bf16 %v3016_v2, %v3009_v11  ;;  %v3029_v20 = vsub.f32 %v7672_v27, %v8545_v44  ;;  %v8547_v52 = vand.u32 4294901760, %v7678_v41  ;;  %v8579_v44 = vld [vmem:[#allocation43_spill] sm:$0xff] }
 0x324   : > { %v3023_v2 = vand.u32 4294901760, %v3022_v38  ;;  %v8550_v38 = vpack.c.bf16 %v7552_v47, %v7550_v31  ;;  %v8553_v31 = vpack.c.bf16 %v7572_v4, %v7570_v21  ;;  %v8554_v47 = vpack.c.bf16 %v7581_v37, %v7574_v24 }
 0x325   : > { %5759 = vmatpush3.bf16.xpose.msra.mxu1 %v5758_v61  ;;  %v2381_v11 = vsub.f32 %v7678_v41, %v8547_v52  ;;  %v8559_v21 = vpack.c.bf16 %v7632_v62, %v7629_v57  ;;  %v8560_v4 = vpack.c.bf16 %v7640_v33, %v7638_v28  ;;  %v8565_v57 = vld [vmem:[#allocation55_spill] sm:$0xff]  ;;  %v8567_v62 = vld [vmem:[#allocation57_spill] sm:$0xff]  ;;  %v8568_v28 = vld [vmem:[#allocation10_spill] sm:$0xff] }
 0x326   : > { %5760 = vmatprep.subr.bf16.mxu1 %v8351_v10  ;;  %v8569_v33 = vld [vmem:[#allocation11_spill] sm:$0xff]  ;;  %v8585_v52 = vld [vmem:[#allocation13_spill] sm:$0xff] }
 0x327   : > { %5615 = vmatpush3.bf16.xpose.msra.mxu0 %v5614_v60  ;;  %v5617_v60 = vpack.c.bf16 %v2368_v25, %v2361_v36  ;;  %v8549_v36 = vpack.c.bf16 %v7548_v42, %v7546_v15  ;;  %v8551_v15 = vpack.c.bf16 %v7556_v56, %v7554_v5  ;;  %v8552_v42 = vpack.c.bf16 %v7568_v54, %v7559_v58  ;;  %v8577_v25 = vld [vmem:[#allocation37_spill] sm:$0xff] }
 0x328   : > { %5616 = vmatprep.subr.bf16.mxu0 %v8351_v10  ;;  %v8555_v5 = vpack.c.bf16 %v7590_v3, %v7583_v26  ;;  %v8556_v56 = vpack.c.bf16 %v7596_v51, %v7594_v63  ;;  %v8557_v58 = vpack.c.bf16 %v7604_v23, %v7602_v59  ;;  %v8558_v54 = vpack.c.bf16 %v7625_v35, %v7618_v53 }
 0x329   : > { %v1870_v14 = vpop.f32.mrb[4].mxu0  ;;  %v1956_v9 = vpop.f32.mrb[4].mxu1  ;;  %v8561_v59 = vpack.c.bf16 %v7646_v45, %v7644_v13  ;;  %v8562_v23 = vpack.c.bf16 %v7666_v55, %v7657_v16  ;;  %v8563_v53 = vpack.c.bf16 %v7672_v27, %v7670_v7  ;;  %v8564_v35 = vpack.c.bf16 %v7678_v41, %v7676_v22  ;;  %v8566_v7 = vld [vmem:[#allocation56_spill] sm:$0xff]  ;;  %v8570_v13 = vld [vmem:[#allocation18_spill] sm:$0xff]  ;;  %v8571_v45 = vld [vmem:[#allocation19_spill] sm:$0xff] }
 0x32a   : > { %v1871_v61 = vadd.f32 %v1870_v14, %v7700_v6  ;;  %v4616_v46 = vpop.f32.mrb[5].mxu0  ;;  %v4651_v49 = vpop.f32.mrb[5].mxu1  ;;  %v8546_v6 = vand.u32 4294901760, %v7676_v22  ;;  %v3030_v14 = vand.u32 4294901760, %v3029_v20  ;;  %v8572_v27 = vld [vmem:[#allocation24_spill] sm:$0xff]  ;;  %v8573_v16 = vld [vmem:[#allocation25_spill] sm:$0xff] }
 0x32b   : > { %v2382_v49 = vand.u32 4294901760, %v2381_v11  ;;  %v8574_v55 = vld [vmem:[#allocation30_spill] sm:$0xff]  ;;  %v8576_v41 = vld [vmem:[#allocation36_spill] sm:$0xff] }
 0x32c   : > { %v1957_v34 = vadd.f32 %v1956_v9, %v1871_v61  ;;  %v2374_v40 = vsub.f32 %v7676_v22, %v8546_v6  ;;  %v5764_v9 = vpack.c.bf16 %v3030_v14, %v3023_v2  ;;  %v8548_v61 = vmov 1.0   ;;  %v8575_v22 = vld [vmem:[#allocation31_spill] sm:$0xff]  ;;  %v8580_v20 = vld [vmem:[#allocation46_spill] sm:$0xff]  ;;  %v8583_v6 = vld [vmem:[#allocation12_spill] sm:$0xff] }
 0x32d   : > { %5762 = vmatpush3.bf16.xpose.msra.mxu1 %v5761_v32 }
 0x32e   : > { %5763 = vmatprep.subr.bf16.mxu1 %v8351_v10  ;;  %v2375_v46 = vand.u32 4294901760, %v2374_v40  ;;  %v8584_v40 = vld [vmem:[#allocation9_spill] sm:$0xff] }
 0x32f   : > { %5618 = vmatpush3.bf16.xpose.msra.mxu0 %v5617_v60  ;;  %v8582_v60 = vld [vmem:[#allocation8_spill] sm:$0xff] }
 0x330   : > { %5619 = vmatprep.subr.bf16.mxu0 %v8351_v10  ;;  %v5620_v32 = vpack.c.bf16 %v2382_v49, %v2375_v46 }
 0x335   : > { %5765 = vmatpush3.bf16.xpose.msra.mxu1 %v5764_v9 }
 0x336   : > { %5766 = vmatprep.subr.bf16.mxu1 %v8351_v10 }
 0x337   : > { %5621 = vmatpush3.bf16.xpose.msra.mxu0 %v5620_v32 }
 0x338   : > { %5622 = vmatprep.subr.bf16.mxu0 %v8351_v10 }
 0x33c   : > { %5000 = vmatmul.mubr.f32.vlgmr.msra.gmra.mrb[8].mxu1 %v8548_v61 }
 0x33d   : > { %5768 = vmatpush3.bf16.xpose.msra.mxu1 %v8549_v36  ;;  %5034 = vmatprep.mubr.msk.f32.mxu1 %vm6065_vm0, %v8364_v8 }
 0x33e   : > { %5769 = vmatprep.subr.bf16.mxu1 %v8351_v10  ;;  %4790 = vmatmul.mubr.f32.vlgmr.msra.gmra.mrb[8].mxu0 %v8548_v61 }
 0x33f   : > { %5624 = vmatpush3.bf16.xpose.msra.mxu0 %v8550_v38  ;;  %4824 = vmatprep.mubr.msk.f32.mxu0 %vm6065_vm0, %v8364_v8 }
 0x340   : > { %5625 = vmatprep.subr.bf16.mxu0 %v8351_v10 }
 0x345   : > { %5771 = vmatpush3.bf16.xpose.msra.mxu1 %v8551_v15 }
 0x346   : > { %5772 = vmatprep.subr.bf16.mxu1 %v8351_v10 }
 0x347   : > { %5627 = vmatpush3.bf16.xpose.msra.mxu0 %v8552_v42 }
 0x348   : > { %5628 = vmatprep.subr.bf16.mxu0 %v8351_v10 }
 0x34d   : > { %5774 = vmatpush3.bf16.xpose.msra.mxu1 %v8553_v31 }
 0x34e   : > { %5775 = vmatprep.subr.bf16.mxu1 %v8351_v10 }
 0x34f   : > { %5630 = vmatpush3.bf16.xpose.msra.mxu0 %v8554_v47 }
 0x350   : > { %5631 = vmatprep.subr.bf16.mxu0 %v8351_v10 }
 0x355   : > { %5777 = vmatpush3.bf16.xpose.msra.mxu1 %v8555_v5 }
 0x356   : > { %5778 = vmatprep.subr.bf16.mxu1 %v8351_v10 }
 0x357   : > { %5633 = vmatpush3.bf16.xpose.msra.mxu0 %v8556_v56 }
 0x358   : > { %5634 = vmatprep.subr.bf16.mxu0 %v8351_v10 }
 0x35d   : > { %5780 = vmatpush3.bf16.xpose.msra.mxu1 %v8557_v58 }
 0x35e   : > { %5781 = vmatprep.subr.bf16.mxu1 %v8351_v10 }
 0x35f   : > { %5636 = vmatpush3.bf16.xpose.msra.mxu0 %v8558_v54 }
 0x360   : > { %5637 = vmatprep.subr.bf16.mxu0 %v8351_v10 }
 0x365   : > { %5783 = vmatpush3.bf16.xpose.msra.mxu1 %v8559_v21 }
 0x366   : > { %5784 = vmatprep.subr.bf16.mxu1 %v8351_v10 }
 0x367   : > { %5639 = vmatpush3.bf16.xpose.msra.mxu0 %v8560_v4 }
 0x368   : > { %5640 = vmatprep.subr.bf16.mxu0 %v8351_v10 }
 0x369   : > { %v2074_v24 = vpop.f32.mrb[6].mxu0  ;;  %v2160_v37 = vpop.f32.mrb[6].mxu1 }
 0x36a   : > { %v2075_v26 = vadd.f32 %v2074_v24, %v1957_v34  ;;  %v4686_v3 = vpop.f32.mrb[7].mxu0  ;;  %v4721_v63 = vpop.f32.mrb[7].mxu1  ;;  %v8581_v34 = vld [vmem:[#allocation49_spill] sm:$0xff] }
 0x36c   : > { %v8023_v51 = vadd.f32 %v2160_v37, %v2075_v26 }
 0x36d   : > { %5786 = vmatpush3.bf16.xpose.msra.mxu1 %v8561_v59 }
 0x36e   : > { %5787 = vmatprep.subr.bf16.mxu1 %v8351_v10 }
 0x36f   : > { %5642 = vmatpush3.bf16.xpose.msra.mxu0 %v8562_v23 }
 0x370   : > { %5643 = vmatprep.subr.bf16.mxu0 %v8351_v10 }
 0x375   : > { %5789 = vmatpush3.bf16.xpose.msra.mxu1 %v8563_v53 }
 0x376   : > { %5790 = vmatprep.subr.bf16.mxu1 %v8351_v10 }
 0x377   : > { %5645 = vmatpush3.bf16.xpose.msra.mxu0 %v8564_v35 }
 0x378   : > { %5646 = vmatprep.subr.bf16.mxu0 %v8351_v10 }
 0x37c   : > { %5035 = vmatmul.mubr.f32.vlgmr.msra.gmra.mrb[8].mxu1 %v8364_v8 }
 0x37d   : > { %5792 = vmatpush3.bf16.xpose.msra.mxu1 %v7492_v30  ;;  %5069 = vmatprep.mubr.msk.f32.mxu1 %vm6065_vm0, %v8364_v8 }
 0x37e   : > { %5793 = vmatprep.subr.bf16.mxu1 %v8351_v10  ;;  %4825 = vmatmul.mubr.f32.vlgmr.msra.gmra.mrb[8].mxu0 %v8364_v8 }
 0x37f   : > { %5648 = vmatpush3.bf16.xpose.msra.mxu0 %v7499_v0  ;;  %4859 = vmatprep.mubr.msk.f32.mxu0 %vm6065_vm0, %v8364_v8 }
 0x380   : > { %5649 = vmatprep.subr.bf16.mxu0 %v8351_v10 }
 0x385   : > { %5795 = vmatpush3.bf16.xpose.msra.mxu1 %v7508_v39 }
 0x386   : > { %5796 = vmatprep.subr.bf16.mxu1 %v8351_v10 }
 0x387   : > { %5651 = vmatpush3.bf16.xpose.msra.mxu0 %v7515_v29 }
 0x388   : > { %5652 = vmatprep.subr.bf16.mxu0 %v8351_v10 }
 0x38d   : > { %5798 = vmatpush3.bf16.xpose.msra.mxu1 %v7524_v17 }
 0x38e   : > { %5799 = vmatprep.subr.bf16.mxu1 %v8351_v10 }
 0x38f   : > { %5654 = vmatpush3.bf16.xpose.msra.mxu0 %v7531_v12 }
 0x390   : > { %5655 = vmatprep.subr.bf16.mxu0 %v8351_v10 }
 0x395   : > { %5801 = vmatpush3.bf16.xpose.msra.mxu1 %v7540_v19 }
 0x396   : > { %5802 = vmatprep.subr.bf16.mxu1 %v8351_v10 }
 0x397   : > { %5657 = vmatpush3.bf16.xpose.msra.mxu0 %v7561_v50 }
 0x398   : > { %5658 = vmatprep.subr.bf16.mxu0 %v8351_v10 }
 0x39d   : > { %5804 = vmatpush3.bf16.xpose.msra.mxu1 %v7598_v43 }
 0x39e   : > { %5805 = vmatprep.subr.bf16.mxu1 %v8351_v10 }
 0x39f   : > { %5660 = vmatpush3.bf16.xpose.msra.mxu0 %v8565_v57 }
 0x3a0   : > { %5661 = vmatprep.subr.bf16.mxu0 %v8351_v10 }
 0x3a5   : > { %5807 = vmatpush3.bf16.xpose.msra.mxu1 %v8566_v7 }
 0x3a6   : > { %5808 = vmatprep.subr.bf16.mxu1 %v8351_v10 }
 0x3a7   : > { %5663 = vmatpush3.bf16.xpose.msra.mxu0 %v8567_v62 }
 0x3a8   : > { %5664 = vmatprep.subr.bf16.mxu0 %v8351_v10 }
 0x3ad   : > { %5810 = vmatpush3.bf16.xpose.msra.mxu1 %v7642_v18 }
 0x3ae   : > { %5811 = vmatprep.subr.bf16.mxu1 %v8351_v10 }
 0x3af   : > { %5666 = vmatpush3.bf16.xpose.msra.mxu0 %v7655_v48 }
 0x3b0   : > { %5667 = vmatprep.subr.bf16.mxu0 %v8351_v10 }
 0x3b5   : > { %5813 = vmatpush3.bf16.xpose.msra.mxu1 %v8568_v28 }
 0x3b6   : > { %5814 = vmatprep.subr.bf16.mxu1 %v8351_v10 }
 0x3b7   : > { %5669 = vmatpush3.bf16.xpose.msra.mxu0 %v8569_v33 }
 0x3b8   : > { %5670 = vmatprep.subr.bf16.mxu0 %v8351_v10 }
 0x3bc   : > { %5070 = vmatmul.mubr.f32.vlgmr.msra.gmra.mrb[8].mxu1 %v8364_v8 }
 0x3bd   : > { %5816 = vmatpush3.bf16.xpose.msra.mxu1 %v8570_v13  ;;  %5104 = vmatprep.mubr.msk.f32.mxu1 %vm6065_vm0, %v8364_v8 }
 0x3be   : > { %5817 = vmatprep.subr.bf16.mxu1 %v8351_v10  ;;  %4860 = vmatmul.mubr.f32.vlgmr.msra.gmra.mrb[8].mxu0 %v8364_v8 }
 0x3bf   : > { %5672 = vmatpush3.bf16.xpose.msra.mxu0 %v8571_v45  ;;  %4894 = vmatprep.mubr.msk.f32.mxu0 %vm6065_vm0, %v8364_v8 }
 0x3c0   : > { %5673 = vmatprep.subr.bf16.mxu0 %v8351_v10 }
 0x3c5   : > { %5819 = vmatpush3.bf16.xpose.msra.mxu1 %v8572_v27 }
 0x3c6   : > { %5820 = vmatprep.subr.bf16.mxu1 %v8351_v10 }
 0x3c7   : > { %5675 = vmatpush3.bf16.xpose.msra.mxu0 %v8573_v16 }
 0x3c8   : > { %5676 = vmatprep.subr.bf16.mxu0 %v8351_v10 }
 0x3cd   : > { %5822 = vmatpush3.bf16.xpose.msra.mxu1 %v8574_v55 }
 0x3ce   : > { %5823 = vmatprep.subr.bf16.mxu1 %v8351_v10 }
 0x3cf   : > { %5678 = vmatpush3.bf16.xpose.msra.mxu0 %v8575_v22 }
 0x3d0   : > { %5679 = vmatprep.subr.bf16.mxu0 %v8351_v10 }
 0x3d5   : > { %5825 = vmatpush3.bf16.xpose.msra.mxu1 %v8576_v41 }
 0x3d6   : > { %5826 = vmatprep.subr.bf16.mxu1 %v8351_v10 }
 0x3d7   : > { %5681 = vmatpush3.bf16.xpose.msra.mxu0 %v8577_v25 }
 0x3d8   : > { %5682 = vmatprep.subr.bf16.mxu0 %v8351_v10 }
 0x3dd   : > { %5828 = vmatpush3.bf16.xpose.msra.mxu1 %v8578_v1 }
 0x3de   : > { %5829 = vmatprep.subr.bf16.mxu1 %v8351_v10 }
 0x3df   : > { %5684 = vmatpush3.bf16.xpose.msra.mxu0 %v8579_v44 }
 0x3e0   : > { %5685 = vmatprep.subr.bf16.mxu0 %v8351_v10 }
 0x3e5   : > { %5831 = vmatpush3.bf16.xpose.msra.mxu1 %v8580_v20 }
 0x3e6   : > { %5832 = vmatprep.subr.bf16.mxu1 %v8351_v10 }
 0x3e7   : > { %5687 = vmatpush3.bf16.xpose.msra.mxu0 %v8581_v34 }
 0x3e8   : > { %5688 = vmatprep.subr.bf16.mxu0 %v8351_v10 }
 0x3ed   : > { %5834 = vmatpush3.bf16.xpose.msra.mxu1 %v8582_v60 }
 0x3ee   : > { %5835 = vmatprep.subr.bf16.mxu1 %v8351_v10 }
 0x3ef   : > { %5690 = vmatpush3.bf16.xpose.msra.mxu0 %v8583_v6 }
 0x3f0   : > { %5691 = vmatprep.subr.bf16.mxu0 %v8351_v10 }
 0x3f5   : > { %5837 = vmatpush3.bf16.xpose.msra.mxu1 %v8584_v40 }
 0x3f6   : > { %5838 = vmatprep.subr.bf16.mxu1 %v8351_v10 }
 0x3f7   : > { %5693 = vmatpush3.bf16.xpose.msra.mxu0 %v8585_v52 }
 0x3f8   : > { %5694 = vmatprep.subr.bf16.mxu0 %v8351_v10 }
 0x3fc   : > { %5105 = vmatmul.mubr.f32.vlgmr.msra.gmra.mrb[8].mxu1 %v8548_v61 }
 0x3fd   : > { %5840 = vmatpush3.bf16.xpose.msra.mxu1 %v7492_v30  ;;  %5139 = vmatprep.mubr.msk.f32.mxu1 %vm6065_vm0, %v8364_v8 }
 0x3fe   : > { %5841 = vmatprep.subr.bf16.mxu1 %v8351_v10  ;;  %4895 = vmatmul.mubr.f32.vlgmr.msra.gmra.mrb[8].mxu0 %v8548_v61 }
 0x3ff   : > { %5696 = vmatpush3.bf16.xpose.msra.mxu0 %v7499_v0  ;;  %4929 = vmatprep.mubr.msk.f32.mxu0 %vm6065_vm0, %v8364_v8  ;;  %v8586_v8 = vld [vmem:[#allocation54_spill] sm:$0xff] }
 0x400   : > { %5697 = vmatprep.subr.bf16.mxu0 %v8351_v10  ;;  %v3464_v30 = vmul.f32 2.0, %v8586_v8 }
 0x405   : > { %5843 = vmatpush3.bf16.xpose.msra.mxu1 %v7508_v39 }
 0x406   : > { %5844 = vmatprep.subr.bf16.mxu1 %v8351_v10 }
 0x407   : > { %5699 = vmatpush3.bf16.xpose.msra.mxu0 %v7515_v29 }
 0x408   : > { %5700 = vmatprep.subr.bf16.mxu0 %v8351_v10 }
 0x40d   : > { %5846 = vmatpush3.bf16.xpose.msra.mxu1 %v7524_v17  ;;  %v3462_v17 = vmul.f32 %v8586_v8, %v8586_v8 }
 0x40e   : > { %5847 = vmatprep.subr.bf16.mxu1 %v8351_v10 }
 0x40f   : > { %5702 = vmatpush3.bf16.xpose.msra.mxu0 %v7531_v12 }
 0x410   : > { %5703 = vmatprep.subr.bf16.mxu0 %v8351_v10 }
 0x415   : > { %5849 = vmatpush3.bf16.xpose.msra.mxu1 %v7540_v19 }
 0x416   : > { %5850 = vmatprep.subr.bf16.mxu1 %v8351_v10 }
 0x417   : > { %5705 = vmatpush3.bf16.xpose.msra.mxu0 %v7561_v50 }
 0x418   : > { %5706 = vmatprep.subr.bf16.mxu0 %v8351_v10 }
 0x41d   : > { %5852 = vmatpush3.bf16.xpose.msra.mxu1 %v7598_v43 }
 0x41e   : > { %5853 = vmatprep.subr.bf16.mxu1 %v8351_v10 }
 0x41f   : > { %5708 = vmatpush3.bf16.xpose.msra.mxu0 %v8565_v57 }
 0x420   : > { %5709 = vmatprep.subr.bf16.mxu0 %v8351_v10 }
 0x425   : > { %5855 = vmatpush3.bf16.xpose.msra.mxu1 %v8566_v7 }
 0x426   : > { %5856 = vmatprep.subr.bf16.mxu1 %v8351_v10 }
 0x427   : > { %5711 = vmatpush3.bf16.xpose.msra.mxu0 %v8567_v62 }
 0x428   : > { %5712 = vmatprep.subr.bf16.mxu0 %v8351_v10 }
 0x42d   : > { %5858 = vmatpush3.bf16.xpose.msra.mxu1 %v7642_v18 }
 0x42e   : > { %5859 = vmatprep.subr.bf16.mxu1 %v8351_v10 }
 0x42f   : > { %5714 = vmatpush3.bf16.xpose.msra.mxu0 %v7655_v48 }
 0x430   : > { %5715 = vmatprep.subr.bf16.mxu0 %v8351_v10 }
 0x435   : > { %5861 = vmatpush3.bf16.xpose.msra.mxu1 %v8568_v28 }
 0x437   : > { %5717 = vmatpush3.bf16.xpose.msra.mxu0 %v8569_v33 }
 0x43c   : > { %5140 = vmatmul.mubr.f32.vlgmr.msra.gmra.mrb[8].mxu1 %v8548_v61 }
 0x43e   : > { %4930 = vmatmul.mubr.f32.vlgmr.msra.gmra.mrb[8].mxu0 %v8548_v61 }
 0x50f   : > { %v3458_v0 = vpop.f32.mrb[8].mxu1 }
 0x510   : > { %v3465_v39 = vmul.f32 %v3464_v30, %v3458_v0  ;;  %v5141_v29 = vpop.f32.mrb[9].mxu1 }
 0x511   : > { %v2810_v12 = vpop.f32.mrb[8].mxu0 }
 0x512   : > { %v3463_v19 = vmul.f32 %v3462_v17, %v2810_v12  ;;  %v4931_v10 = vpop.f32.mrb[9].mxu0 }
 0x514   : > { %v3466_v50 = vsub.f32 %v3463_v19, %v3465_v39 }
 0x516   : > { %v3467_v43 = vadd.f32 %v3466_v50, %v8023_v51 }
 0x518   : > { %v3468_v18 = vadd.f32 1e-09, %v3467_v43 }
 0x51a   : > { %5954 = vrcp.f32 %v3468_v18 }
 0x524   : > { %v5955_v48 = vpop.eup %5954 }
 0x525   : > { %v3470_v11 = vmul.f32 %v5955_v48, %v3463_v19 }
 0x527   : > { %5956 = vlog2.f32 %v3470_v11 }
 0x531   : > { %v5957_v2 = vpop.eup %5956 }
 0x532   : > { %v3472_v14 = vmul.f32 0.6931472, %v5957_v2 }
 0x534   : > { %v3473_v46 = vmul.f32 0.4342945, %v3472_v14 }
 0x536   : > { %v3474_v49 = vmul.f32 10.0, %v3473_v46 }
 0x538   : > { %v3476_v9 = vsel %vm3475_vm1, %v3474_v49, 0.0 }
 0x539   : > { %3477 = vadd.xlane.f32.xlu0 %v3476_v9 }
 0x5c6   : > { %v3478_v32 = vpop.xlane.xlu0 %3477 }
 0x5c7   : > { %v3479_v61 = vsub.f32 0.0, %v3478_v32 }
 0x5c9   : > { %v3481_v36 = vmul.f32 0.0078125, %v3479_v61 }
 0x5cb   : > { %3483 = vst.msk [vmem:[%s199_s22] sm:$0x1] %vm3482_vm2, %v3481_v36 }
 0x5cc PF: > { %p15_p11 = scmp.ge.s32.totalorder %s6105_s14, 6   ;;  %s8587_s9 = smov %s6050_s10 }
 0x5cd   : > { %s8588_s10 = smov %s6054_s11  ;;  %s8589_s11 = smov %s6115_s17 }
 0x5ce   : > { %s8590_s12 = smov %s6105_s14  ;;  %17 = sbr.rel (!%p15_p11) target bundleno = 5 (0x5), region = 81 }
 0x5d5   :  { %3501 = vsyncpa [#allocation3], 1 }
 0x5d6   :  { %3503 = vsyncpa [#allocation3 + $0x1], 1 }
 0x5d7   :  { %3504 = vsyncpa [#allocation5], 1 }
 0x5d8   :  { %3506 = vsyncpa [#allocation5 + $0x1], 1 }

</bundles_post_ra>
